<compile_context>
chip_gen: v5e
topology: v5e:2x2
jax: 0.10.0
libtpu: 0.0.40
codegen_flags: <defaults>
</compile_context>

<pallas_src>
from typing import NamedTuple

import jax
import jax.numpy as jnp
from jax.experimental import pallas as pl
from jax.experimental.pallas import tpu as pltpu

LANE = 128


def _round_up(n, m):
    return ((n + m - 1) // m) * m


class TFIDFParams(NamedTuple):
    """Padded, bf16-cast TwoLayerTFIDF weights (built once at model-load time)."""
    w1p: jax.Array   # (VOC_pad, H1_pad) bf16
    b1p: jax.Array   # (1, H1_pad)       f32
    w2p: jax.Array   # (H1_pad, H2_pad)  bf16
    b2p: jax.Array   # (1, H2_pad)       f32
    w3p: jax.Array   # (H2_pad, OUT_pad) bf16
    b3p: jax.Array   # (1, OUT_pad)      f32
    voc: int
    out: int
    tk: int
    voc_pad: int
    n_blocks: int
    h1_pad: int
    h2_pad: int
    out_pad: int


def prepare_tfidf_params(w1, b1, w2, b2, w3, b3, *, tk=4096):
    """Pads + casts the weights once.  Call at load time, not per forward.

    w1: (VOC, H1), b1: (H1,) or (1, H1); w2: (H1, H2); w3: (H2, OUT).
    `tk` is the requested vocabulary tile (multiple of 128).  Per generation:
    v5e ~2048-4096, v6e ~4096-8192, v7x <= ~8192 (64 MiB physical VMEM); the
    wrapper sets vmem_limit_bytes from the actual footprint either way.
    """
    VOC, H1 = w1.shape
    H2 = w2.shape[1]
    OUT = w3.shape[1]

    f32, bf16 = jnp.float32, jnp.bfloat16

    # Tile selection: round tk to a lane multiple, then re-derive it from the
    # block count so vocab padding waste is < 128 rows per tile.
    voc128 = _round_up(VOC, LANE)
    tk = max(LANE, _round_up(min(int(tk), voc128), LANE))
    n_blocks = -(-voc128 // tk)
    tk = _round_up(-(-voc128 // n_blocks), LANE)
    VOC_pad = n_blocks * tk

    H1_pad = _round_up(H1, LANE)
    H2_pad = _round_up(H2, LANE)
    OUT_pad = LANE  # lane-dense output store; wrapper slices [:, :OUT]

    # Zero-padding is exact: zero feature columns / zero weight rows+cols and
    # zero biases are no-ops through Linear + ReLU.
    w1p = jnp.zeros((VOC_pad, H1_pad), bf16).at[:VOC, :H1].set(w1.astype(bf16))
    b1p = jnp.zeros((1, H1_pad), f32).at[:, :H1].set(b1.reshape(1, H1).astype(f32))
    w2p = jnp.zeros((H1_pad, H2_pad), bf16).at[:H1, :H2].set(w2.astype(bf16))
    b2p = jnp.zeros((1, H2_pad), f32).at[:, :H2].set(b2.reshape(1, H2).astype(f32))
    w3p = jnp.zeros((H2_pad, OUT_pad), bf16).at[:H2, :OUT].set(w3.astype(bf16))
    b3p = jnp.zeros((1, OUT_pad), f32).at[:, :OUT].set(b3.reshape(1, OUT).astype(f32))

    return TFIDFParams(w1p, b1p, w2p, b2p, w3p, b3p,
                       voc=VOC, out=OUT, tk=tk, voc_pad=VOC_pad,
                       n_blocks=n_blocks, h1_pad=H1_pad, h2_pad=H2_pad,
                       out_pad=OUT_pad)


def _mlp_kernel(blk_ids_ref, n_active_ref,              # scalar prefetch (SMEM)
                x_ref, w1_ref, b1_ref, w2_ref, b2_ref, w3_ref, b3_ref,
                o_ref, acc_ref):
    """K-tiled 3-layer MLP over the ACTIVE tf-idf vocabulary tiles.

    Grid axis 0 has n_blocks steps; blk_ids_ref holds the active vocab-tile
    indices first, then repeats the last active index (those tail steps have
    their DMA elided by the pipeline and their compute skipped here).  Layer-1
    partials accumulate into an f32 VMEM scratch; layers 2/3 and the lane-dense
    output store run once on the final step.
    """
    k = pl.program_id(0)

    @pl.when(k == 0)
    def _init():
        acc_ref[...] = jnp.zeros_like(acc_ref)

    # Layer-1 partial: bf16 operands, f32 accumulation on the MXU.  Only for
    # real (active) vocab tiles; duplicate tail tiles are skipped.
    @pl.when(k < n_active_ref[0])
    def _accumulate():
        acc_ref[...] += jnp.dot(x_ref[...], w1_ref[...],
                                preferred_element_type=jnp.float32)

    @pl.when(k == pl.num_programs(0) - 1)
    def _finalize():
        h1 = jnp.maximum(acc_ref[...] + b1_ref[...], 0.0)
        h2 = jnp.dot(h1.astype(jnp.bfloat16), w2_ref[...],
                     preferred_element_type=jnp.float32)
        h2 = jnp.maximum(h2 + b2_ref[...], 0.0)
        logits = jnp.dot(h2.astype(jnp.bfloat16), w3_ref[...],
                         preferred_element_type=jnp.float32)
        o_ref[...] = (logits + b3_ref[...]).astype(o_ref.dtype)


def tfidf_mlp_forward(x, params: TFIDFParams):
    """Runs the TwoLayerTFIDF head in one Pallas kernel.

    x: (B, VOC) float tf-idf features.  Returns logits: (B, OUT) float32.
    """
    B, VOC = x.shape
    assert VOC == params.voc, (VOC, params.voc)

    f32, bf16 = jnp.float32, jnp.bfloat16
    tk, VOC_pad, n_blocks = params.tk, params.voc_pad, params.n_blocks
    H1_pad, H2_pad, OUT_pad = params.h1_pad, params.h2_pad, params.out_pad

    # bf16 activations -> (16, 128) sublane/lane packing for the batch dim.
    B_pad = _round_up(max(B, 16), 16)
    xp = jnp.zeros((B_pad, VOC_pad), bf16).at[:B, :VOC].set(x.astype(bf16))

    # ---- tf-idf sparsity: which vocab tiles have any nonzero column (batch union)?
    blocks_active = jnp.any(xp.reshape(B_pad, n_blocks, tk) != 0, axis=(0, 2))
    order = jnp.argsort(jnp.where(blocks_active, 0, 1)).astype(jnp.int32)  # active first
    n_active = jnp.sum(blocks_active).astype(jnp.int32)
    last_active = order[jnp.maximum(n_active - 1, 0)]
    step_ids = jnp.arange(n_blocks, dtype=jnp.int32)
    # Tail steps repeat the last active tile -> unchanged block index -> DMA elided.
    blk_ids = jnp.where(step_ids < n_active, order, last_active)
    n_active_arr = n_active.reshape((1,))

    # ---- VMEM budget for the chosen tile (x + w1 double-buffered, rest resident).
    footprint = (2 * B_pad * tk * 2                         # x double-buffer (bf16)
                 + 2 * tk * H1_pad * 2                      # w1 double-buffer (bf16)
                 + params.w2p.size * 2 + params.w3p.size * 2
                 + (params.b1p.size + params.b2p.size + params.b3p.size) * 4
                 + B_pad * H1_pad * 4                       # f32 accumulator scratch
                 + 2 * B_pad * OUT_pad * 4)                 # output buffers
    vmem_limit = int(min(max(2 * footprint, 32 << 20), 48 << 20))

    cost = pl.CostEstimate(
        flops=2 * B_pad * (VOC_pad * H1_pad + H1_pad * H2_pad + H2_pad * OUT_pad),
        transcendentals=0,
        bytes_accessed=(xp.size * 2 + params.w1p.size * 2
                        + params.w2p.size * 2 + params.w3p.size * 2
                        + (params.b1p.size + params.b2p.size + params.b3p.size) * 4
                        + B_pad * OUT_pad * 4),
    )

    const2d = lambda shape: pl.BlockSpec(shape, lambda k, blk, na: (0, 0))

    logits_pad = pl.pallas_call(
        _mlp_kernel,
        out_shape=jax.ShapeDtypeStruct((B_pad, OUT_pad), f32),
        grid_spec=pltpu.PrefetchScalarGridSpec(
            num_scalar_prefetch=2,           # blk_ids, n_active -> SMEM
            grid=(n_blocks,),
            in_specs=[
                pl.BlockSpec((B_pad, tk), lambda k, blk, na: (0, blk[k])),   # x tile
                pl.BlockSpec((tk, H1_pad), lambda k, blk, na: (blk[k], 0)),  # w1 tile
                const2d((1, H1_pad)),            # b1 (resident)
                const2d((H1_pad, H2_pad)),       # w2 (resident)
                const2d((1, H2_pad)),            # b2
                const2d((H2_pad, OUT_pad)),      # w3 (lane-padded)
                const2d((1, OUT_pad)),           # b3
            ],
            out_specs=pl.BlockSpec((B_pad, OUT_pad), lambda k, blk, na: (0, 0)),
            scratch_shapes=[pltpu.VMEM((B_pad, H1_pad), jnp.float32)],
        ),
        # Vocabulary reduction axis -> "arbitrary".
        compiler_params=pltpu.CompilerParams(
            dimension_semantics=("arbitrary",),
            vmem_limit_bytes=vmem_limit,
        ),
        cost_estimate=cost,
    )(blk_ids, n_active_arr, xp, params.w1p, params.b1p, params.w2p, params.b2p,
      params.w3p, params.b3p)

    return logits_pad[:B, :params.out]


class LogitReturnType:
    def __init__(self, logits):
        self.logits = logits

    def __getitem__(self, string):
        if string == "logits":
            return self.logits
        raise ValueError(f"Invalid attribute {string} for LogitReturnType.")


def _init_linear(key, fan_in, fan_out):
    # Mirrors torch.nn.Linear default init: U(-1/sqrt(fan_in), 1/sqrt(fan_in)).
    kw, kb = jax.random.split(key)
    bound = 1.0 / jnp.sqrt(fan_in)
    w = jax.random.uniform(kw, (fan_in, fan_out), jnp.float32, -bound, bound)
    b = jax.random.uniform(kb, (1, fan_out), jnp.float32, -bound, bound)
    return w, b


def _ref_forward(x, w1, b1, w2, b2, w3, b3):
    # Plain-JAX reference mirroring the kernel precision path
    # (bf16 operands, f32 accumulation) so tolerances stay tight.
    bf16, f32 = jnp.bfloat16, jnp.float32
    h = jnp.dot(x.astype(bf16), w1.astype(bf16), preferred_element_type=f32)
    h = jnp.maximum(h + b1, 0.0)
    h = jnp.dot(h.astype(bf16), w2.astype(bf16), preferred_element_type=f32)
    h = jnp.maximum(h + b2, 0.0)
    out = jnp.dot(h.astype(bf16), w3.astype(bf16), preferred_element_type=f32)
    return out + b3


if __name__ == "__main__":
    # Small shapes consistent with TFIDFModel defaults
    # (hidden_dim=768, hidden_dim2=150, final logits=2; modest vocab).
    B, VOC, H1, H2, OUT = 8, 2048, 768, 150, 2

    key = jax.random.PRNGKey(0)
    k_x, k1, k2, k3 = jax.random.split(key, 4)

    # TODO(synk): tokenizer.decode + sklearn TfidfVectorizer.transform are
    # string/CPU preprocessing with no Pallas equivalent; substitute a
    # deterministic synthetic non-negative sparse tf-idf feature matrix.
    x = jax.random.uniform(k_x, (B, VOC), jnp.float32)
    x = jnp.where(x > 0.8, x, 0.0)                       # mostly zeros, like tf-idf rows
    cols = jnp.arange(VOC)[None, :]
    x = jnp.where(cols < 1200, x, 0.0)                   # tail vocab unused -> exercises tile skip

    w1, b1 = _init_linear(k1, VOC, H1)
    w2, b2 = _init_linear(k2, H1, H2)
    w3, b3 = _init_linear(k3, H2, OUT)

    # Weights padded + cast to bf16 ONCE (model-load time), not per forward.
    params = prepare_tfidf_params(w1, b1, w2, b2, w3, b3, tk=512)

    logits = tfidf_mlp_forward(x, params)
    out = LogitReturnType(logits)
    jax.block_until_ready(out["logits"])

    ref = _ref_forward(x, w1, b1, w2, b2, w3, b3)
    assert out["logits"].shape == (B, OUT)
    err = jnp.max(jnp.abs(out["logits"] - ref))
    assert jnp.allclose(out["logits"], ref, atol=5e-3, rtol=5e-3), err

    print("KERNEL_OK")
</pallas_src>

<mosaic_0001>
module attributes {stable_mosaic.version = 11 : i64} {
  func.func @_mlp_kernel(%arg0: i32, %arg1: memref<4xi32, #tpu.memory_space<smem>>, %arg2: memref<1xi32, #tpu.memory_space<smem>>, %arg3: memref<16x512xbf16, #tpu.memory_space<vmem>>, %arg4: memref<512x768xbf16, #tpu.memory_space<vmem>>, %arg5: memref<1x768xf32, #tpu.memory_space<vmem>>, %arg6: memref<768x256xbf16, #tpu.memory_space<vmem>>, %arg7: memref<1x256xf32, #tpu.memory_space<vmem>>, %arg8: memref<256x128xbf16, #tpu.memory_space<vmem>>, %arg9: memref<1x128xf32, #tpu.memory_space<vmem>>, %arg10: memref<16x128xf32, #tpu.memory_space<vmem>>, %arg11: memref<16x768xf32, #tpu.memory_space<vmem>>) attributes {dimension_semantics = [#tpu.dimension_semantics<arbitrary>], iteration_bounds = array<i64: 4>, scalar_prefetch = 2 : i64, scratch_operands = 1 : i64, tpu.core_type = #tpu.core_type<tc>, window_params = [{transform_indices = @transform_0, window_bounds = array<i64: 16, 512>}, {transform_indices = @transform_1, window_bounds = array<i64: 512, 768>}, {pipeline_mode = #tpu.pipeline_mode<synchronous>, transform_indices = @transform_2, window_bounds = array<i64: 1, 768>}, {pipeline_mode = #tpu.pipeline_mode<synchronous>, transform_indices = @transform_3, window_bounds = array<i64: 768, 256>}, {pipeline_mode = #tpu.pipeline_mode<synchronous>, transform_indices = @transform_4, window_bounds = array<i64: 1, 256>}, {pipeline_mode = #tpu.pipeline_mode<synchronous>, transform_indices = @transform_5, window_bounds = array<i64: 256, 128>}, {pipeline_mode = #tpu.pipeline_mode<synchronous>, transform_indices = @transform_6, window_bounds = array<i64: 1, 128>}, {pipeline_mode = #tpu.pipeline_mode<synchronous>, transform_indices = @transform_7, window_bounds = array<i64: 16, 128>}]} {
    %c0_i32 = arith.constant 0 : i32
    %0 = arith.cmpi eq, %arg0, %c0_i32 : i32
    %1 = arith.extui %0 : i1 to i32
    %c0_i32_0 = arith.constant 0 : i32
    %2 = arith.cmpi ne, %1, %c0_i32_0 : i32
    scf.if %2 {
      %cst = arith.constant 0.000000e+00 : f32
      %10 = vector.broadcast %cst : f32 to vector<16x768xf32>
      %c0_3 = arith.constant 0 : index
      %c0_4 = arith.constant 0 : index
      %11 = vector.load %arg11[%c0_3, %c0_4] : memref<16x768xf32, #tpu.memory_space<vmem>>, vector<16x768xf32>
      tpu.vector_store %arg11[%c0_3, %c0_4], %10 {strides = array<i32>} : memref<16x768xf32, #tpu.memory_space<vmem>>, vector<16x768xf32>,
    } else {
    }
    %c0 = arith.constant 0 : index
    %3 = memref.load %arg2[%c0] : memref<1xi32, #tpu.memory_space<smem>>
    %4 = arith.cmpi slt, %arg0, %3 : i32
    %5 = arith.extui %4 : i1 to i32
    %c0_i32_1 = arith.constant 0 : i32
    %6 = arith.cmpi ne, %5, %c0_i32_1 : i32
    scf.if %6 {
      %c0_3 = arith.constant 0 : index
      %c0_4 = arith.constant 0 : index
      %10 = vector.load %arg11[%c0_3, %c0_4] : memref<16x768xf32, #tpu.memory_space<vmem>>, vector<16x768xf32>
      %c0_5 = arith.constant 0 : index
      %c0_6 = arith.constant 0 : index
      %11 = vector.load %arg3[%c0_5, %c0_6] : memref<16x512xbf16, #tpu.memory_space<vmem>>, vector<16x512xbf16>
      %c0_7 = arith.constant 0 : index
      %c0_8 = arith.constant 0 : index
      %12 = vector.load %arg4[%c0_7, %c0_8] : memref<512x768xbf16, #tpu.memory_space<vmem>>, vector<512x768xbf16>
      %cst = arith.constant dense<0.000000e+00> : vector<16x768xf32>
      %13 = tpu.matmul %11, %12, %cst {dimension_numbers = #tpu.dot_dimension_numbers<[1], [0], [0], [1], [0, 0, 1, 1], [], []>} : vector<16x512xbf16>, vector<512x768xbf16>, vector<16x768xf32> -> vector<16x768xf32>
      %14 = arith.addf %10, %13 : vector<16x768xf32>
      %c0_9 = arith.constant 0 : index
      %c0_10 = arith.constant 0 : index
      %15 = vector.load %arg11[%c0_9, %c0_10] : memref<16x768xf32, #tpu.memory_space<vmem>>, vector<16x768xf32>
      tpu.vector_store %arg11[%c0_9, %c0_10], %14 {strides = array<i32>} : memref<16x768xf32, #tpu.memory_space<vmem>>, vector<16x768xf32>,
    } else {
    }
    %c3_i32 = arith.constant 3 : i32
    %7 = arith.cmpi eq, %arg0, %c3_i32 : i32
    %8 = arith.extui %7 : i1 to i32
    %c0_i32_2 = arith.constant 0 : i32
    %9 = arith.cmpi ne, %8, %c0_i32_2 : i32
    scf.if %9 {
      %c0_3 = arith.constant 0 : index
      %c0_4 = arith.constant 0 : index
      %10 = vector.load %arg11[%c0_3, %c0_4] : memref<16x768xf32, #tpu.memory_space<vmem>>, vector<16x768xf32>
      %c0_5 = arith.constant 0 : index
      %c0_6 = arith.constant 0 : index
      %11 = vector.load %arg5[%c0_5, %c0_6] : memref<1x768xf32, #tpu.memory_space<vmem>>, vector<1x768xf32>
      %12 = vector.broadcast %11 : vector<1x768xf32> to vector<16x768xf32>
      %13 = arith.addf %10, %12 : vector<16x768xf32>
      %cst = arith.constant 0.000000e+00 : f32
      %14 = vector.broadcast %cst : f32 to vector<16x768xf32>
      %15 = arith.maximumf %13, %14 : vector<16x768xf32>
      %16 = arith.truncf %15 : vector<16x768xf32> to vector<16x768xbf16>
      %c0_7 = arith.constant 0 : index
      %c0_8 = arith.constant 0 : index
      %17 = vector.load %arg6[%c0_7, %c0_8] : memref<768x256xbf16, #tpu.memory_space<vmem>>, vector<768x256xbf16>
      %cst_9 = arith.constant dense<0.000000e+00> : vector<16x256xf32>
      %18 = tpu.matmul %16, %17, %cst_9 {dimension_numbers = #tpu.dot_dimension_numbers<[1], [0], [0], [1], [0, 0, 1, 1], [], []>} : vector<16x768xbf16>, vector<768x256xbf16>, vector<16x256xf32> -> vector<16x256xf32>
      %c0_10 = arith.constant 0 : index
      %c0_11 = arith.constant 0 : index
      %19 = vector.load %arg7[%c0_10, %c0_11] : memref<1x256xf32, #tpu.memory_space<vmem>>, vector<1x256xf32>
      %20 = vector.broadcast %19 : vector<1x256xf32> to vector<16x256xf32>
      %21 = arith.addf %18, %20 : vector<16x256xf32>
      %cst_12 = arith.constant 0.000000e+00 : f32
      %22 = vector.broadcast %cst_12 : f32 to vector<16x256xf32>
      %23 = arith.maximumf %21, %22 : vector<16x256xf32>
      %24 = arith.truncf %23 : vector<16x256xf32> to vector<16x256xbf16>
      %c0_13 = arith.constant 0 : index
      %c0_14 = arith.constant 0 : index
      %25 = vector.load %arg8[%c0_13, %c0_14] : memref<256x128xbf16, #tpu.memory_space<vmem>>, vector<256x128xbf16>
      %cst_15 = arith.constant dense<0.000000e+00> : vector<16x128xf32>
      %26 = tpu.matmul %24, %25, %cst_15 {dimension_numbers = #tpu.dot_dimension_numbers<[1], [0], [0], [1], [0, 0, 1, 1], [], []>} : vector<16x256xbf16>, vector<256x128xbf16>, vector<16x128xf32> -> vector<16x128xf32>
      %c0_16 = arith.constant 0 : index
      %c0_17 = arith.constant 0 : index
      %27 = vector.load %arg9[%c0_16, %c0_17] : memref<1x128xf32, #tpu.memory_space<vmem>>, vector<1x128xf32>
      %28 = vector.broadcast %27 : vector<1x128xf32> to vector<16x128xf32>
      %29 = arith.addf %26, %28 : vector<16x128xf32>
      %c0_18 = arith.constant 0 : index
      %c0_19 = arith.constant 0 : index
      %30 = vector.load %arg10[%c0_18, %c0_19] : memref<16x128xf32, #tpu.memory_space<vmem>>, vector<16x128xf32>
      tpu.vector_store %arg10[%c0_18, %c0_19], %29 {strides = array<i32>} : memref<16x128xf32, #tpu.memory_space<vmem>>, vector<16x128xf32>,
    } else {
    }
    return
  }
  func.func @transform_0(%arg0: i32, %arg1: memref<4xi32, #tpu.memory_space<smem>>, %arg2: memref<1xi32, #tpu.memory_space<smem>>) -> (i32, i32) {
    %0 = arith.index_cast %arg0 : i32 to index
    %1 = memref.load %arg1[%0] : memref<4xi32, #tpu.memory_space<smem>>
    %c0_i32 = arith.constant 0 : i32
    %c0_i32_0 = arith.constant 0 : i32
    return %c0_i32, %1 : i32, i32
  }
  func.func @transform_1(%arg0: i32, %arg1: memref<4xi32, #tpu.memory_space<smem>>, %arg2: memref<1xi32, #tpu.memory_space<smem>>) -> (i32, i32) {
    %0 = arith.index_cast %arg0 : i32 to index
    %1 = memref.load %arg1[%0] : memref<4xi32, #tpu.memory_space<smem>>
    %c0_i32 = arith.constant 0 : i32
    %c0_i32_0 = arith.constant 0 : i32
    return %1, %c0_i32 : i32, i32
  }
  func.func @transform_2(%arg0: i32, %arg1: memref<4xi32, #tpu.memory_space<smem>>, %arg2: memref<1xi32, #tpu.memory_space<smem>>) -> (i32, i32) {
    %c0_i32 = arith.constant 0 : i32
    %c0_i32_0 = arith.constant 0 : i32
    %c0_i32_1 = arith.constant 0 : i32
    return %c0_i32, %c0_i32_0 : i32, i32
  }
  func.func @transform_3(%arg0: i32, %arg1: memref<4xi32, #tpu.memory_space<smem>>, %arg2: memref<1xi32, #tpu.memory_space<smem>>) -> (i32, i32) {
    %c0_i32 = arith.constant 0 : i32
    %c0_i32_0 = arith.constant 0 : i32
    %c0_i32_1 = arith.constant 0 : i32
    return %c0_i32, %c0_i32_0 : i32, i32
  }
  func.func @transform_4(%arg0: i32, %arg1: memref<4xi32, #tpu.memory_space<smem>>, %arg2: memref<1xi32, #tpu.memory_space<smem>>) -> (i32, i32) {
    %c0_i32 = arith.constant 0 : i32
    %c0_i32_0 = arith.constant 0 : i32
    %c0_i32_1 = arith.constant 0 : i32
    return %c0_i32, %c0_i32_0 : i32, i32
  }
  func.func @transform_5(%arg0: i32, %arg1: memref<4xi32, #tpu.memory_space<smem>>, %arg2: memref<1xi32, #tpu.memory_space<smem>>) -> (i32, i32) {
    %c0_i32 = arith.constant 0 : i32
    %c0_i32_0 = arith.constant 0 : i32
    %c0_i32_1 = arith.constant 0 : i32
    return %c0_i32, %c0_i32_0 : i32, i32
  }
  func.func @transform_6(%arg0: i32, %arg1: memref<4xi32, #tpu.memory_space<smem>>, %arg2: memref<1xi32, #tpu.memory_space<smem>>) -> (i32, i32) {
    %c0_i32 = arith.constant 0 : i32
    %c0_i32_0 = arith.constant 0 : i32
    %c0_i32_1 = arith.constant 0 : i32
    return %c0_i32, %c0_i32_0 : i32, i32
  }
  func.func @transform_7(%arg0: i32, %arg1: memref<4xi32, #tpu.memory_space<smem>>, %arg2: memref<1xi32, #tpu.memory_space<smem>>) -> (i32, i32) {
    %c0_i32 = arith.constant 0 : i32
    %c0_i32_0 = arith.constant 0 : i32
    %c0_i32_1 = arith.constant 0 : i32
    return %c0_i32, %c0_i32_0 : i32, i32
  }
}

</mosaic_0001>

<bundles_post_ra>
// kernel: tpu_custom_call.1
= control target key start
LH: loop header
LB: loop body
LE: loop exit
PB: predicated region body
PF: predicated region fallthrough
CT: control target
= control target key end

     0   :  { %s5157_s14 = smov [#allocation4]   ;;  %s5932_s0 = inlined_call_operand.hbm [shape: s32[4], index: 0, kind: input, shape index: {}]   ;;  %s5933_s1 = inlined_call_operand.<no memory space> [shape: s32[1], index: 1, kind: input, shape index: {}]   ;;  %s5934_s2 = inlined_call_operand.hbm [shape: bf16[16,2048], index: 2, kind: input, shape index: {}]   ;;  %s5935_s3 = inlined_call_operand.hbm [shape: bf16[2048,768], index: 3, kind: input, shape index: {}]   ;;  %s5936_s4 = inlined_call_operand.hbm [shape: f32[1,768], index: 4, kind: input, shape index: {}]   ;;  %s5937_s5 = inlined_call_operand.hbm [shape: bf16[768,256], index: 5, kind: input, shape index: {}]   ;;  %s5938_s6 = inlined_call_operand.hbm [shape: f32[1,256], index: 6, kind: input, shape index: {}]   ;;  %s5939_s7 = inlined_call_operand.hbm [shape: bf16[256,128], index: 7, kind: input, shape index: {}]   ;;  %s5940_s8 = inlined_call_operand.hbm [shape: f32[1,128], index: 8, kind: input, shape index: {}]   ;;  %s5941_s9 = inlined_call_operand.hbm [shape: f32[16,128], index: 9, kind: output, shape index: {}]  }
   0x1   :  { %5945 = sst [smem:[#allocation31_spill]] %s5934_s2  ;;  %s15_s11 = sshll.u32 %s5932_s0, 4  ;;  %s16_s11 = int_to_ptr.hbm [resolvable:$true] %s15_s11 }
   0x2   :  { %5946 = sst [smem:[#allocation32_spill]] %s5936_s4 }
   0x3   :  { %5947 = sst [smem:[#allocation33_spill]] %s5937_s5 }
   0x4   :  { %5948 = sst [smem:[#allocation34_spill]] %s5938_s6 }
   0x5   :  { %5949 = sst [smem:[#allocation35_spill]] %s5939_s7 }
   0x6   :  { %5950 = sst [smem:[#allocation36_spill]] %s5940_s8 }
   0x7   :  { %19 = sst [smem:[#allocation5]] %s5933_s1 }
   0x8   :  { %18 = dma.hbm_to_smem %s16_s11, 16, %s5157_s14, [#allocation3] }
   0x9   :  { %5103 = dma.done.wait [#allocation3], 16 }
   0xa   :  { %5104 = vsyncadd [#allocation3], 4294967280 }
   0xb   :  { %22 = sfence }
   0xc   :  { %23 = vsyncpa [#allocation7], 0 }
   0xd   :  { %25 = vsyncpa [#allocation7 + $0x1], 0 }
   0xe   :  { %26 = vsyncpa [#allocation10], 0 }
   0xf   :  { %28 = vsyncpa [#allocation10 + $0x1], 0 }
  0x10   :  { %29 = vsyncpa [#allocation13], 0 }
  0x11   :  { %30 = vsyncpa [#allocation16], 0 }
  0x12   :  { %31 = vsyncpa [#allocation8], 0  ;;  %s5232_s15 = smov 0   ;;  %s5234_s0 = smov 0  }
  0x13   :  { %s5236_s16 = smov 0   ;;  %s5238_s1 = smov 0  }
  0x14   :  { %s5240_s17 = smov 0   ;;  %s5242_s18 = smov 0  }
  0x15   :  { %s5244_s19 = smov 0  }
  0x16 LB: > { %s5951_s4 = sld [smem:[#allocation32_spill]]  ;;  %s5271_s23 = sadd.s32 4294967295, %s5155_s19   ;;  %s5155_s19 = sphi %s5244_s19, %s5982_s19   ;;  %s5151_s18 = sphi %s5242_s18, %s5981_s18   ;;  %s5147_s17 = sphi %s5240_s17, %s5980_s17   ;;  %s5143_s1 = sphi %s5238_s1, %s5979_s1   ;;  %s5139_s16 = sphi %s5236_s16, %s5978_s16   ;;  %s5135_s0 = sphi %s5234_s0, %s5977_s0   ;;  %s5131_s15 = sphi %s5232_s15, %s5976_s15  }
  0x17   : > { %p3106_p0 = scmp.ge.s32.totalorder %s5155_s19, 1  ;;  %p5943_p1 = scmp.eq.s32.totalorder %s5271_s23, 0 }
  0x18   : > { %p224_p2 = scmp.lt.s32.totalorder %s5155_s19, 5  ;;  %s5158_s25 = smov [#allocation11]  }
  0x19   : > { %s238_s26 = sshll.u32 %s5158_s25, 4  ;;  %s5953_s5 = sld [smem:[#allocation33_spill]]  ;;  %s239_s26 = int_to_ptr.vmem [resolvable:$true] %s238_s26 }
  0x1a   : > { %p5277_p4 = pnand %p3106_p0, %p224_p2  ;;  %s5159_s10 = smov [#allocation12]  }
  0x1b   : > { %s249_s11 = sshll.u32 %s5159_s10, 4  ;;  %s5160_s12 = smov 128   ;;  %s250_s11 = int_to_ptr.vmem [resolvable:$true] %s249_s11 }
  0x1c   : > { %s236_s22 = sshll.u32 %s5951_s4, 4  ;;  %p4709_p5 = pneg %p5277_p4  ;;  %s237_s22 = int_to_ptr.hbm [resolvable:$true] %s236_s22 }
  0x1d   : > { %s5161_s13 = smov 8   ;;  %s5955_s7 = sld [smem:[#allocation35_spill]] }
  0x1e   : > { %p5288_p6 = pnand %p4709_p5, %p5943_p1  ;;  %s5162_s25 = smov [#allocation15]  }
  0x1f   : > { %s247_s29 = sshll.u32 %s5953_s5, 4  ;;  %s275_s27 = sshll.u32 %s5162_s25, 4  ;;  %s248_s29 = int_to_ptr.hbm [resolvable:$true] %s247_s29  ;;  %s276_s27 = int_to_ptr.vmem [resolvable:$true] %s275_s27 }
  0x20   : > { %4712 = dma.hbm_to_vmem [thread:$0]  (!%p5288_p6), %s237_s22, 96, %s239_s26, [#allocation10]  }
  0x21   : > { %4715 = dma.hbm_to_vmem [thread:$0]  (!%p5288_p6), %s248_s29, 12288, %s250_s11, [#allocation13], %s5160_s12, %s5160_s12, %s5161_s13  }
  0x22   : > { %s5956_s6 = sld [smem:[#allocation34_spill]]  ;;  %s5163_s22 = smov 64  }
  0x23   : > { %s273_s21 = sshll.u32 %s5955_s7, 4  ;;  %s5164_s26 = smov 4   ;;  %s274_s21 = int_to_ptr.hbm [resolvable:$true] %s273_s21 }
  0x24   : > { %4721 = dma.hbm_to_vmem [thread:$0]  (!%p5288_p6), %s274_s21, 2048, %s276_s27, [#allocation16], %s5163_s22, %s5163_s22, %s5164_s26  }
  0x25   : > { %s5165_s29 = smov [#allocation14]   ;;  %s5957_s8 = sld [smem:[#allocation36_spill]] }
  0x26   : > { %s264_s11 = sshll.u32 %s5165_s29, 4  ;;  %s5166_s14 = smov [#allocation17]   ;;  %s265_s11 = int_to_ptr.vmem [resolvable:$true] %s264_s11 }
  0x27   : > { %s290_s20 = sshll.u32 %s5166_s14, 4  ;;  %s5312_s21 = sadd.s32 1, %s5155_s19   ;;  %s291_s20 = int_to_ptr.vmem [resolvable:$true] %s290_s20 }
  0x28   : > { %s262_s10 = sshll.u32 %s5956_s6, 4  ;;  %s41_s25 = sld [smem:[#allocation4 + %s5155_s19]]  ;;  %s263_s10 = int_to_ptr.hbm [resolvable:$true] %s262_s10 }
  0x29   : > { %4718 = dma.hbm_to_vmem [thread:$0]  (!%p5288_p6), %s263_s10, 32, %s265_s11, [#allocation13]  }
  0x2a   : > { %s42_s27 = sld [smem:[#allocation4 + %s5312_s21]]  ;;  %p53_p7 = scmp.ne.s32.totalorder %s5151_s18, %s5147_s17 }
  0x2b   : > { %s288_s4 = sshll.u32 %s5957_s8, 4  ;;  %p54_p8 = scmp.eq.s32.totalorder %s5155_s19, 0  ;;  %s289_s4 = int_to_ptr.hbm [resolvable:$true] %s288_s4 }
  0x2c   : > { %4724 = dma.hbm_to_vmem [thread:$0]  (!%p5288_p6), %s289_s4, 16, %s291_s20, [#allocation16]  }
  0x2d   : > { %p59_p9 = scmp.ne.s32.totalorder %s5147_s17, %s5143_s1  ;;  %s46_s28 = sadd.s32 1, %s5151_s18 }
  0x2e   : > { %s301_s10 = sand.u32 1, %s5151_s18   ;;  %p5944_p11 = scmp.lt.s32.totalorder %s5155_s19, 4 }
  0x2f   : > { %p5325_p10 = por %p5943_p1, %p59_p9  ;;  %p55_p12 = por %p54_p8, %p53_p7 }
  0x30   : > { %s3113_s30 = sshll.u32 %s301_s10, 5  ;;  %s43_s26 = ssub.s32 %s41_s25, %s42_s27 }
  0x31   : > { %p5334_p13 = pnand %p5944_p11, %p55_p12  ;;  %p44_p0 = scmp.eq.s32.totalorder %s43_s26, 0 }
  0x32   : > { %s305_s29 = scalar_lea.vmem [#allocation6], %s3113_s30  ;;  %s5350_s20 = sld [smem:[#allocation4 + %s5155_s19]] }
  0x33   : > { %s5338_s11 = sshll.u32 %s305_s29, 4  ;;  %s5353_s25 = sld [smem:[#allocation4 + %s5312_s21]] }
  0x34   : > { %5960 = sst [smem:[#allocation30_spill]] %s5338_s11  ;;  %p81_p2 = scmp.ne.s32.totalorder %s5139_s16, %s5135_s0 }
  0x35   : > { %s4687_s12 = scalar_select %p55_p12, [#allocation4], [#allocation19] }
  0x36   : > { %s5341_s13 = scalar_select %p44_p0, %s5151_s18, %s46_s28  }
  0x37   : > { %s4688_s4 = scalar_select %p55_p12, %s5155_s19, 0 }
  0x38   : > { %s5984_s12 = smov (!%p5944_p11, %s4687_s12), [#allocation21]  ;;  %s5961_s2 = sld [smem:[#allocation31_spill]] }
  0x39   : > { %s5986_s4 = smov (!%p5944_p11, %s4688_s4), 0  ;;  %p87_p5 = scmp.ne.s32.totalorder %s5135_s0, %s5131_s15 }
  0x3a   : > { %s306_s14 = sld [smem:[%s5984_s12 + %s5986_s4]]  ;;  %s74_s5 = sadd.s32 1, %s5139_s16 }
  0x3b   : > { %p5365_p6 = por %p87_p5, %p5943_p1  ;;  %s302_s12 = scalar_lea.sflag [#allocation7], %s301_s10 }
  0x3c   : > { %p4991_p9 = pneg %p5334_p13 }
  0x3e   : > { %s4994_s15 = scalar_lea.hbm %s5961_s2, 128 }
  0x40   : > { %s4365_s27 = sshll.u32 %s306_s14, 4 }
  0x41   : > { %s311_s29 = scalar_lea.hbm %s5961_s2, %s4365_s27 }
  0x42   : > { %s312_s28 = sshll.u32 %s311_s29, 4  ;;  %s313_s28 = int_to_ptr.hbm [resolvable:$true] %s312_s28 }
  0x43   : > { %s4987_s4 = sshra.s32 %s313_s28, 4  ;;  %s4988_s4 = int_to_ptr.hbm [resolvable:$true] %s4987_s4 }
  0x44   : > { %s4989_s11 = scalar_lea.hbm %s4988_s4, 32  ;;  %p4995_p5 = scmp.lt.s32.totalorder %s4988_s4, %s5961_s2 }
  0x45   : > { %p4990_p7 = scmp.ne.s32.totalorder %s4988_s4, %s4989_s11  ;;  %p4996_p3 = scmp.lt.s32.totalorder %s4994_s15, %s4989_s11 }
  0x47   : > { %p4992_p12 = pnand %p4991_p9, %p4990_p7  ;;  %p4997_p1 = por %p4996_p3, %p4995_p5 }
  0x49   : > { %p4993_p0 = pneg %p4992_p12 }
  0x4b   : > { %p4998_p11 = pnand %p4997_p1, %p4993_p0 }
  0x4d   : > { %5001 = shalt.err (!%p4998_p11)
}
  0x4e   : > { %s5167_s10 = smov 1024   ;;  %s5963_s29 = sld [smem:[#allocation30_spill]] }
  0x4f   : > { %s5168_s4 = smov 256   ;;  %s5169_s11 = smov 16  }
  0x50   : > { %s71_s27 = ssub.s32 %s5350_s20, %s5353_s25  ;;  %p83_p1 = por %p81_p2, %p54_p8 }
  0x51   : > { %p72_p3 = scmp.eq.s32.totalorder %s71_s27, 0  ;;  %s326_s15 = sand.u32 1, %s5139_s16  }
  0x52   : > { %p5965_p11 = scmp.lt.s32.totalorder %s5155_s19, 4  ;;  %s4674_s7 = smul.u32 1536, %s326_s15 }
  0x53   : > { %s5396_s26 = scalar_select %p72_p3, %s5139_s16, %s74_s5  }
  0x54   : > { %s5964_s14 = int_to_ptr.vmem [resolvable:$true] %s5963_s29  ;;  %p5391_p7 = pnand %p5965_p11, %p83_p1 }
  0x55   : > { %4730 = dma.hbm_to_vmem [thread:$0]  (!%p5334_p13), %s313_s28, 512, %s5964_s14, %s302_s12, %s5167_s10, %s5168_s4, %s5169_s11  }
  0x56   : > { %s4690_s2 = scalar_select %p83_p1, [#allocation4], [#allocation20] }
  0x57   : > { %s4691_s8 = scalar_select %p83_p1, %s5155_s19, 0 }
  0x58   : > { %p5967_p9 = pmov %p5965_p11  ;;  %s324_s20 = sand.u32 1, %s5155_s19  }
  0x59   : > { %s328_s25 = scalar_lea.vmem [#allocation9], %s4674_s7  ;;  %s325_s11 = scalar_lea.sflag [#allocation10], %s324_s20 }
  0x5a   : > { %s5988_s2 = smov (!%p5967_p9, %s4690_s2), [#allocation22]  ;;  %p5968_p12 = pmov %p5967_p9 }
  0x5b   : > { %s338_s28 = sshll.u32 %s328_s25, 4  ;;  %p5021_p13 = pneg %p5391_p7  ;;  %s339_s28 = int_to_ptr.vmem [resolvable:$true] %s338_s28 }
  0x5c   : > { %s5990_s8 = smov (!%p5968_p12, %s4691_s8), 0 }
  0x5d   : > { %s329_s1 = sld [smem:[%s5988_s2 + %s5990_s8]]  ;;  %s5024_s8 = scalar_lea.hbm %s5935_s3, 6144 }
  0x63   : > { %s4675_s12 = smul.u32 1536, %s329_s1 }
  0x65   : > { %s335_s4 = scalar_lea.hbm %s5935_s3, %s4675_s12 }
  0x66   : > { %s336_s5 = sshll.u32 %s335_s4, 4  ;;  %s337_s5 = int_to_ptr.hbm [resolvable:$true] %s336_s5 }
  0x67   : > { %s5017_s14 = sshra.s32 %s337_s5, 4  ;;  %s5018_s14 = int_to_ptr.hbm [resolvable:$true] %s5017_s14 }
  0x68   : > { %s5019_s27 = scalar_lea.hbm %s5018_s14, 1536  ;;  %p5025_p5 = scmp.lt.s32.totalorder %s5018_s14, %s5935_s3 }
  0x69   : > { %p5020_p8 = scmp.ne.s32.totalorder %s5018_s14, %s5019_s27  ;;  %p5026_p1 = scmp.lt.s32.totalorder %s5024_s8, %s5019_s27 }
  0x6b   : > { %p5022_p2 = pnand %p5021_p13, %p5020_p8  ;;  %p5027_p3 = por %p5026_p1, %p5025_p5 }
  0x6d   : > { %p5023_p0 = pneg %p5022_p2 }
  0x6f   : > { %p5028_p11 = pnand %p5027_p3, %p5023_p0 }
  0x71   : > { %5031 = shalt.err (!%p5028_p11)
}
  0x72   : > { %s5170_s1 = smov 384   ;;  %s5171_s20 = smov 24  }
  0x73   : > { %4735 = dma.hbm_to_vmem [thread:$0]  (!%p5391_p7), %s337_s5, 24576, %s339_s28, %s325_s11, %s5170_s1, %s5170_s1, %s5171_s20  }
  0x74   : > { %350 = sbr.rel (%p5277_p4) target bundleno = 910 (0x38e), region = 48  ;;  %s352_s25 = sand.u32 (!%p5277_p4), 1, %s5147_s17  }
  0x75   : > { %s3120_s12 = sshll.u32 (!%p5277_p4), %s352_s25, 5  ;;  %s353_s10 = scalar_lea.sflag (!%p5277_p4), [#allocation7], %s352_s25 }
  0x76   : > { %s5420_s29 = scalar_lea.vmem (!%p5277_p4), [#allocation6], %s3120_s12 }
  0x79   : > { %5106 = dma.done.wait (%p5325_p10), %s353_s10, 512  }
  0x7a   : > { %5108 = vsyncadd (%p5325_p10), %s353_s10, 4294966784  ;;  %s362_s30 = sand.u32 1, %s5271_s23   ;;  %s364_s28 = sand.u32 1, %s5135_s0  }
  0x7b   : > { %s4676_s4 = smul.u32 1536, %s364_s28  ;;  %s363_s24 = scalar_lea.sflag [#allocation10], %s362_s30 }
  0x7d   : > { %s5428_s5 = scalar_lea.vmem [#allocation9], %s4676_s4 }
  0x7e   : > { %5110 = dma.done.wait (%p5365_p6), %s363_s24, 24576  }
  0x7f   : > { %5112 = vsyncadd (%p5365_p6), %s363_s24, 4294942720  ;;  %p5969_p4 = scmp.eq.s32.totalorder %s5271_s23, 0 }
  0x81   : > { %5114 = dma.done.wait (%p5969_p4), [#allocation10], 96   ;;  %p5970_p7 = pmov %p5969_p4 }
  0x82   : > { %p5971_p10 = pmov %p5969_p4 }
  0x83   : > { %5116 = vsyncadd (%p5970_p7), [#allocation10], 4294967200 }
  0x84   : > { %5118 = dma.done.wait (%p5971_p10), [#allocation13], 12320   ;;  %p5972_p9 = pmov %p5969_p4 }
  0x85   : > { %p5973_p12 = pmov %p5969_p4 }
  0x86   : > { %5120 = vsyncadd (%p5972_p9), [#allocation13], 4294954976 }
  0x87   : > { %5122 = dma.done.wait (%p5973_p12), [#allocation16], 2064   ;;  %p5974_p8 = pmov %p5969_p4 }
  0x88   : > { %p5975_p6 = scmp.ne.s32.totalorder %s5271_s23, 0 }
  0x89   : > { %5124 = vsyncadd (%p5974_p8), [#allocation16], 4294965232 }
  0x8a   : > { %430 = sbr.rel (%p5975_p6) target bundleno = 156 (0x9c), region = 80 }
  0x8f   : > { %v5172_v0 = vmov 0.0  }
  0x90   : > { %431 = vst [vmem:[#allocation2 + $0x30] sm:$0xff] %v5172_v0 }
  0x91   : > { %432 = vst [vmem:[#allocation2] sm:$0xff] %v5172_v0 }
  0x92   : > { %433 = vst [vmem:[#allocation2 + $0x58] sm:$0xff] %v5172_v0 }
  0x93   : > { %434 = vst [vmem:[#allocation2 + $0x18] sm:$0xff] %v5172_v0 }
  0x94   : > { %435 = vst [vmem:[#allocation2 + $0x50] sm:$0xff] %v5172_v0 }
  0x95   : > { %436 = vst [vmem:[#allocation2 + $0x20] sm:$0xff] %v5172_v0 }
  0x96   : > { %437 = vst [vmem:[#allocation2 + $0x8] sm:$0xff] %v5172_v0 }
  0x97   : > { %438 = vst [vmem:[#allocation2 + $0x38] sm:$0xff] %v5172_v0 }
  0x98   : > { %439 = vst [vmem:[#allocation2 + $0x28] sm:$0xff] %v5172_v0 }
  0x99   : > { %440 = vst [vmem:[#allocation2 + $0x48] sm:$0xff] %v5172_v0 }
  0x9a   : > { %441 = vst [vmem:[#allocation2 + $0x10] sm:$0xff] %v5172_v0 }
  0x9b   : > { %442 = vst [vmem:[#allocation2 + $0x40] sm:$0xff] %v5172_v0 }
  0x9c PF: > { %s443_s6 = sld [smem:[#allocation5]] }
  0xa2   : > { %p3127_p13 = scmp.ge.s32.totalorder %s5271_s23, %s443_s6 }
  0xa4   : > { %447 = sbr.rel (%p3127_p13) target bundleno = 512 (0x200), region = 84 }
  0xa9   : > { %v3314_v1 = vld [vmem:[%s5428_s5 + $0x150] sm:$0xf]  ;;  %v4415_v2 = vld [vmem:[%s5428_s5 + $0x164] sm:$0xf0]  ;;  %v3290_v12 = vld [vmem:[%s5428_s5 + $0x120] sm:$0xf] }
  0xaa   : > { %v3506_v3 = vld [vmem:[%s5428_s5 + $0x2d0] sm:$0xf]  ;;  %v3315_v4 = vor.u32 %v4415_v2, %v3314_v1  ;;  %v4463_v5 = vld [vmem:[%s5428_s5 + $0x2e4] sm:$0xf0]  ;;  %v4409_v14 = vld [vmem:[%s5428_s5 + $0x134] sm:$0xf0] }
  0xab   : > { %v3698_v6 = vld [vmem:[%s5428_s5 + $0x450] sm:$0xf]  ;;  %v4511_v7 = vld [vmem:[%s5428_s5 + $0x464] sm:$0xf0]  ;;  %v3507_v8 = vor.u32 %v4463_v5, %v3506_v3  ;;  %v3482_v15 = vld [vmem:[%s5428_s5 + $0x2a0] sm:$0xf]  ;;  %v3291_v17 = vor.u32 %v4409_v14, %v3290_v12 }
  0xac   : > { %v3699_v9 = vor.u32 %v4511_v7, %v3698_v6  ;;  %v3890_v10 = vld [vmem:[%s5428_s5 + $0x5d0] sm:$0xf]  ;;  %v4559_v11 = vld [vmem:[%s5428_s5 + $0x5e4] sm:$0xf0]  ;;  %1636 = vmatpush.bf16.msra.mxu0 %v3315_v4  ;;  %v4457_v16 = vld [vmem:[%s5428_s5 + $0x2b4] sm:$0xf0] }
  0xad   : > { %v3891_v13 = vor.u32 %v4559_v11, %v3890_v10  ;;  %1650 = vmatpush.bf16.msra.mxu1 %v3507_v8  ;;  %v3483_v18 = vor.u32 %v4457_v16, %v3482_v15  ;;  %v3674_v19 = vld [vmem:[%s5428_s5 + $0x420] sm:$0xf]  ;;  %v4505_v20 = vld [vmem:[%s5428_s5 + $0x434] sm:$0xf0]  ;;  %v3266_v24 = vld [vmem:[%s5428_s5 + $0xf0] sm:$0xf] }
  0xae   : > { %1664 = vmatpush.bf16.msra.mxu2 %v3699_v9  ;;  %v3866_v21 = vld [vmem:[%s5428_s5 + $0x5a0] sm:$0xf]  ;;  %v3675_v22 = vor.u32 %v4505_v20, %v3674_v19  ;;  %v4553_v23 = vld [vmem:[%s5428_s5 + $0x5b4] sm:$0xf0]  ;;  %v4403_v25 = vld [vmem:[%s5428_s5 + $0x104] sm:$0xf0] }
  0xaf   : > { %1678 = vmatpush.bf16.msra.mxu3 %v3891_v13  ;;  %v3867_v26 = vor.u32 %v4553_v23, %v3866_v21  ;;  %v3458_v27 = vld [vmem:[%s5428_s5 + $0x270] sm:$0xf]  ;;  %v4451_v28 = vld [vmem:[%s5428_s5 + $0x284] sm:$0xf0]  ;;  %v3267_v30 = vor.u32 %v4403_v25, %v3266_v24  ;;  %v3242_v36 = vld [vmem:[%s5428_s5 + $0xc0] sm:$0xf] }
  0xb0   : > { %v3650_v29 = vld [vmem:[%s5428_s5 + $0x3f0] sm:$0xf]  ;;  %1637 = vmatpush.bf16.msra.mxu0 %v3291_v17  ;;  %v4499_v31 = vld [vmem:[%s5428_s5 + $0x404] sm:$0xf0]  ;;  %v3459_v34 = vor.u32 %v4451_v28, %v3458_v27  ;;  %v4397_v37 = vld [vmem:[%s5428_s5 + $0xd4] sm:$0xf0] }
  0xb1   : > { %v3842_v32 = vld [vmem:[%s5428_s5 + $0x570] sm:$0xf]  ;;  %v4547_v33 = vld [vmem:[%s5428_s5 + $0x584] sm:$0xf0]  ;;  %1651 = vmatpush.bf16.msra.mxu1 %v3483_v18  ;;  %v3651_v35 = vor.u32 %v4499_v31, %v3650_v29  ;;  %v3434_v38 = vld [vmem:[%s5428_s5 + $0x240] sm:$0xf]  ;;  %v3243_v45 = vor.u32 %v4397_v37, %v3242_v36 }
  0xb2   : > { %1665 = vmatpush.bf16.msra.mxu2 %v3675_v22  ;;  %v3843_v39 = vor.u32 %v4547_v33, %v3842_v32  ;;  %v4445_v40 = vld [vmem:[%s5428_s5 + $0x254] sm:$0xf0]  ;;  %v3626_v41 = vld [vmem:[%s5428_s5 + $0x3c0] sm:$0xf]  ;;  %v3218_v48 = vld [vmem:[%s5428_s5 + $0x90] sm:$0xf] }
  0xb3   : > { %1679 = vmatpush.bf16.msra.mxu3 %v3867_v26  ;;  %v4493_v42 = vld [vmem:[%s5428_s5 + $0x3d4] sm:$0xf0]  ;;  %v3818_v43 = vld [vmem:[%s5428_s5 + $0x540] sm:$0xf]  ;;  %v3435_v46 = vor.u32 %v4445_v40, %v3434_v38  ;;  %v4391_v49 = vld [vmem:[%s5428_s5 + $0xa4] sm:$0xf0] }
  0xb4   : > { %v4541_v44 = vld [vmem:[%s5428_s5 + $0x554] sm:$0xf0]  ;;  %1638 = vmatpush.bf16.msra.mxu0 %v3267_v30  ;;  %v3627_v47 = vor.u32 %v4493_v42, %v3626_v41  ;;  %v3410_v50 = vld [vmem:[%s5428_s5 + $0x210] sm:$0xf]  ;;  %v4439_v52 = vld [vmem:[%s5428_s5 + $0x224] sm:$0xf0]  ;;  %v3219_v57 = vor.u32 %v4391_v49, %v3218_v48 }
  0xb5   : > { %1652 = vmatpush.bf16.msra.mxu1 %v3459_v34  ;;  %v3819_v51 = vor.u32 %v4541_v44, %v3818_v43  ;;  %v3602_v53 = vld [vmem:[%s5428_s5 + $0x390] sm:$0xf]  ;;  %v4487_v54 = vld [vmem:[%s5428_s5 + $0x3a4] sm:$0xf0]  ;;  %v3411_v58 = vor.u32 %v4439_v52, %v3410_v50  ;;  %v3194_v60 = vld [vmem:[%s5428_s5 + $0x60] sm:$0xf] }
  0xb6   : > { %1666 = vmatpush.bf16.msra.mxu2 %v3651_v35  ;;  %v3794_v55 = vld [vmem:[%s5428_s5 + $0x510] sm:$0xf]  ;;  %v4535_v56 = vld [vmem:[%s5428_s5 + $0x524] sm:$0xf0]  ;;  %v3603_v59 = vor.u32 %v4487_v54, %v3602_v53  ;;  %v4385_v61 = vld [vmem:[%s5428_s5 + $0x74] sm:$0xf0] }
  0xb7   : > { %1680 = vmatpush.bf16.msra.mxu3 %v3843_v39  ;;  %v3386_v62 = vld [vmem:[%s5428_s5 + $0x1e0] sm:$0xf]  ;;  %v3795_v63 = vor.u32 %v4535_v56, %v3794_v55  ;;  %v4433_v0 = vld [vmem:[%s5428_s5 + $0x1f4] sm:$0xf0]  ;;  %v3195_v5 = vor.u32 %v4385_v61, %v3194_v60  ;;  %v3170_v8 = vld [vmem:[%s5428_s5 + $0x30] sm:$0xf] }
  0xb8   : > { %1639 = vmatpush.bf16.msra.mxu0 %v3243_v45  ;;  %v3578_v1 = vld [vmem:[%s5428_s5 + $0x360] sm:$0xf]  ;;  %v4481_v2 = vld [vmem:[%s5428_s5 + $0x374] sm:$0xf0]  ;;  %v3387_v6 = vor.u32 %v4433_v0, %v3386_v62  ;;  %v4379_v9 = vld [vmem:[%s5428_s5 + $0x44] sm:$0xf0] }
  0xb9   : > { %1653 = vmatpush.bf16.msra.mxu1 %v3435_v46  ;;  %v3770_v3 = vld [vmem:[%s5428_s5 + $0x4e0] sm:$0xf]  ;;  %v4529_v4 = vld [vmem:[%s5428_s5 + $0x4f4] sm:$0xf0]  ;;  %v3579_v7 = vor.u32 %v4481_v2, %v3578_v1  ;;  %v3362_v10 = vld [vmem:[%s5428_s5 + $0x1b0] sm:$0xf]  ;;  %v3171_v17 = vor.u32 %v4379_v9, %v3170_v8 }
  0xba   : > { %1667 = vmatpush.bf16.msra.mxu2 %v3627_v47  ;;  %v3771_v11 = vor.u32 %v4529_v4, %v3770_v3  ;;  %v4427_v12 = vld [vmem:[%s5428_s5 + $0x1c4] sm:$0xf0]  ;;  %v3554_v13 = vld [vmem:[%s5428_s5 + $0x330] sm:$0xf]  ;;  %v3146_v18 = vld [vmem:[%s5428_s5] sm:$0xf] }
  0xbb   : > { %1681 = vmatpush.bf16.msra.mxu3 %v3819_v51  ;;  %v4475_v14 = vld [vmem:[%s5428_s5 + $0x344] sm:$0xf0]  ;;  %v3746_v15 = vld [vmem:[%s5428_s5 + $0x4b0] sm:$0xf]  ;;  %v4373_v19 = vld [vmem:[%s5428_s5 + $0x14] sm:$0xf0]  ;;  %v3363_v20 = vor.u32 %v4427_v12, %v3362_v10 }
  0xbc   : > { %1640 = vmatpush.bf16.msra.mxu0 %v3219_v57  ;;  %v4523_v16 = vld [vmem:[%s5428_s5 + $0x4c4] sm:$0xf0]  ;;  %v3555_v21 = vor.u32 %v4475_v14, %v3554_v13  ;;  %v3338_v22 = vld [vmem:[%s5428_s5 + $0x180] sm:$0xf]  ;;  %v4421_v23 = vld [vmem:[%s5428_s5 + $0x194] sm:$0xf0]  ;;  %v3147_v32 = vor.u32 %v4373_v19, %v3146_v18 }
  0xbd   : > { %1654 = vmatpush.bf16.msra.mxu1 %v3411_v58  ;;  %v3530_v24 = vld [vmem:[%s5428_s5 + $0x300] sm:$0xf]  ;;  %v3747_v25 = vor.u32 %v4523_v16, %v3746_v15  ;;  %v4469_v26 = vld [vmem:[%s5428_s5 + $0x314] sm:$0xf0]  ;;  %v4412_v29 = vld [vmem:[%s5428_s5 + $0x154] sm:$0xf]  ;;  %v3339_v36 = vor.u32 %v4421_v23, %v3338_v22 }
  0xbe   : > { %1668 = vmatpush.bf16.msra.mxu2 %v3603_v59  ;;  %v3722_v27 = vld [vmem:[%s5428_s5 + $0x480] sm:$0xf]  ;;  %v4517_v28 = vld [vmem:[%s5428_s5 + $0x494] sm:$0xf0]  ;;  %v3316_v30 = vld [vmem:[%s5428_s5 + $0x168] sm:$0xf0]  ;;  %v3531_v37 = vor.u32 %v4469_v26, %v3530_v24 }
  0xbf   : > { %1682 = vmatpush.bf16.msra.mxu3 %v3795_v63  ;;  %v4460_v31 = vld [vmem:[%s5428_s5 + $0x2d4] sm:$0xf]  ;;  %v3508_v33 = vld [vmem:[%s5428_s5 + $0x2e8] sm:$0xf0]  ;;  %v3723_v40 = vor.u32 %v4517_v28, %v3722_v27  ;;  %v3319_v41 = vor.u32 %v4412_v29, %v3316_v30  ;;  %v4406_v44 = vld [vmem:[%s5428_s5 + $0x124] sm:$0xf] }
  0xc0   : > { %1641 = vmatpush.bf16.msra.mxu0 %v3195_v5  ;;  %v4508_v34 = vld [vmem:[%s5428_s5 + $0x454] sm:$0xf]  ;;  %v3700_v35 = vld [vmem:[%s5428_s5 + $0x468] sm:$0xf0]  ;;  %v3511_v42 = vor.u32 %v4460_v31, %v3508_v33  ;;  %v3292_v45 = vld [vmem:[%s5428_s5 + $0x138] sm:$0xf0] }
  0xc1   : > { %1655 = vmatpush.bf16.msra.mxu1 %v3387_v6  ;;  %v4556_v38 = vld [vmem:[%s5428_s5 + $0x5d4] sm:$0xf]  ;;  %v3892_v39 = vld [vmem:[%s5428_s5 + $0x5e8] sm:$0xf0]  ;;  %v3703_v43 = vor.u32 %v4508_v34, %v3700_v35  ;;  %v4454_v46 = vld [vmem:[%s5428_s5 + $0x2a4] sm:$0xf]  ;;  %v3295_v53 = vor.u32 %v4406_v44, %v3292_v45 }
  0xc2   : > { %1669 = vmatpush.bf16.msra.mxu2 %v3579_v7  ;;  %v3895_v47 = vor.u32 %v4556_v38, %v3892_v39  ;;  %v3484_v48 = vld [vmem:[%s5428_s5 + $0x2b8] sm:$0xf0]  ;;  %v4502_v49 = vld [vmem:[%s5428_s5 + $0x424] sm:$0xf]  ;;  %v4400_v56 = vld [vmem:[%s5428_s5 + $0xf4] sm:$0xf] }
  0xc3   : > { %1683 = vmatpush.bf16.msra.mxu3 %v3771_v11  ;;  %v3676_v50 = vld [vmem:[%s5428_s5 + $0x438] sm:$0xf0]  ;;  %v4550_v51 = vld [vmem:[%s5428_s5 + $0x5a4] sm:$0xf]  ;;  %v3487_v54 = vor.u32 %v4454_v46, %v3484_v48  ;;  %v3268_v57 = vld [vmem:[%s5428_s5 + $0x108] sm:$0xf0] }
  0xc4   : > { %1642 = vmatpush.bf16.msra.mxu0 %v3171_v17  ;;  %v3868_v52 = vld [vmem:[%s5428_s5 + $0x5b8] sm:$0xf0]  ;;  %v3679_v55 = vor.u32 %v4502_v49, %v3676_v50  ;;  %v4448_v58 = vld [vmem:[%s5428_s5 + $0x274] sm:$0xf]  ;;  %v3460_v60 = vld [vmem:[%s5428_s5 + $0x288] sm:$0xf0]  ;;  %v3271_v2 = vor.u32 %v4400_v56, %v3268_v57 }
  0xc5   : > { %1656 = vmatpush.bf16.msra.mxu1 %v3363_v20  ;;  %v3871_v59 = vor.u32 %v4550_v51, %v3868_v52  ;;  %v4496_v61 = vld [vmem:[%s5428_s5 + $0x3f4] sm:$0xf]  ;;  %v3652_v62 = vld [vmem:[%s5428_s5 + $0x408] sm:$0xf0]  ;;  %v4394_v1 = vld [vmem:[%s5428_s5 + $0xc4] sm:$0xf]  ;;  %v3463_v6 = vor.u32 %v4448_v58, %v3460_v60 }
  0xc6   : > { %1670 = vmatpush.bf16.msra.mxu2 %v3555_v21  ;;  %v4544_v63 = vld [vmem:[%s5428_s5 + $0x574] sm:$0xf]  ;;  %v3844_v0 = vld [vmem:[%s5428_s5 + $0x588] sm:$0xf0]  ;;  %v3244_v3 = vld [vmem:[%s5428_s5 + $0xd8] sm:$0xf0]  ;;  %v3655_v7 = vor.u32 %v4496_v61, %v3652_v62 }
  0xc7   : > { %1684 = vmatpush.bf16.msra.mxu3 %v3747_v25  ;;  %v3138_v4 = vld [vmem:[%s5420_s29 + $0x8] sm:$0xf]  ;;  %v4369_v5 = vld [vmem:[%s5420_s29 + $0x14] sm:$0xf0]  ;;  %v4442_v8 = vld [vmem:[%s5428_s5 + $0x244] sm:$0xf]  ;;  %v3847_v12 = vor.u32 %v4544_v63, %v3844_v0  ;;  %v3247_v20 = vor.u32 %v4394_v1, %v3244_v3 }
  0xc8   : > { %1643 = vmatpush.bf16.msra.mxu0 %v3147_v32  ;;  %v5542_v9 = vor.u32 %v4369_v5, %v3138_v4  ;;  %v4367_v10 = vld [vmem:[%s5420_s29 + $0xc] sm:$0xf]  ;;  %v3140_v11 = vld [vmem:[%s5420_s29 + $0x18] sm:$0xf0]  ;;  %v4490_v14 = vld [vmem:[%s5428_s5 + $0x3c4] sm:$0xf] }
  0xc9   : > { %1657 = vmatpush.bf16.msra.mxu1 %v3339_v36  ;;  %v3436_v13 = vld [vmem:[%s5428_s5 + $0x258] sm:$0xf0]  ;;  %v5549_v16 = vor.u32 %v4367_v10, %v3140_v11  ;;  %v4538_v17 = vld [vmem:[%s5428_s5 + $0x544] sm:$0xf]  ;;  %v4388_v19 = vld [vmem:[%s5428_s5 + $0x94] sm:$0xf] }
  0xca   : > { %1671 = vmatpush.bf16.msra.mxu2 %v3531_v37  ;;  %v3628_v15 = vld [vmem:[%s5428_s5 + $0x3d8] sm:$0xf0]  ;;  %v3220_v21 = vld [vmem:[%s5428_s5 + $0xa8] sm:$0xf0]  ;;  %v3130_v22 = vld [vmem:[%s5420_s29] sm:$0xf]  ;;  %v3439_v24 = vor.u32 %v4442_v8, %v3436_v13 }
  0xcb   : > { %1685 = vmatpush.bf16.msra.mxu3 %v3723_v40  ;;  %v3820_v18 = vld [vmem:[%s5428_s5 + $0x558] sm:$0xf0]  ;;  %v4368_v23 = vld [vmem:[%s5420_s29 + $0xc] sm:$0xf0]  ;;  %v3631_v25 = vor.u32 %v4490_v14, %v3628_v15  ;;  %v4436_v26 = vld [vmem:[%s5428_s5 + $0x214] sm:$0xf]  ;;  %v3223_v37 = vor.u32 %v4388_v19, %v3220_v21 }
  0xcc   : > { %1692 = vmatpush.bf16.msrb.mxu0 %v3319_v41  ;;  %v5560_v27 = vor.u32 %v4368_v23, %v3130_v22  ;;  %v4366_v28 = vld [vmem:[%s5420_s29 + $0x4] sm:$0xf]  ;;  %v3132_v29 = vld [vmem:[%s5420_s29 + $0x10] sm:$0xf0]  ;;  %v3823_v30 = vor.u32 %v4538_v17, %v3820_v18  ;;  %v3412_v31 = vld [vmem:[%s5428_s5 + $0x228] sm:$0xf0] }
  0xcd   : > { %1706 = vmatpush.bf16.msrb.mxu1 %v3511_v42  ;;  %1672 = vmatmul.bf16.vlgmr.msra.gmra.mxu2 %v5542_v9  ;;  %v4484_v32 = vld [vmem:[%s5428_s5 + $0x394] sm:$0xf]  ;;  %v3604_v33 = vld [vmem:[%s5428_s5 + $0x3a8] sm:$0xf0]  ;;  %v5567_v34 = vor.u32 %v4366_v28, %v3132_v29  ;;  %v3415_v38 = vor.u32 %v4436_v26, %v3412_v31  ;;  %v4382_v40 = vld [vmem:[%s5428_s5 + $0x64] sm:$0xf] }
  0xce   : > { %1720 = vmatpush.bf16.msrb.mxu2 %v3703_v43  ;;  %1686 = vmatmul.bf16.vlgmr.msra.gmra.mxu3 %v5549_v16  ;;  %v4532_v35 = vld [vmem:[%s5428_s5 + $0x514] sm:$0xf]  ;;  %v3796_v36 = vld [vmem:[%s5428_s5 + $0x528] sm:$0xf0]  ;;  %v3607_v39 = vor.u32 %v4484_v32, %v3604_v33  ;;  %v3196_v41 = vld [vmem:[%s5428_s5 + $0x78] sm:$0xf0] }
  0xcf   : > { %1734 = vmatpush.bf16.msrb.mxu3 %v3895_v47  ;;  %1644 = vmatmul.bf16.vlgmr.msra.gmra.mxu0 %v5560_v27  ;;  %v4430_v42 = vld [vmem:[%s5428_s5 + $0x1e4] sm:$0xf]  ;;  %v3799_v43 = vor.u32 %v4532_v35, %v3796_v36  ;;  %v3388_v44 = vld [vmem:[%s5428_s5 + $0x1f8] sm:$0xf0]  ;;  %v3199_v49 = vor.u32 %v4382_v40, %v3196_v41  ;;  %v4376_v52 = vld [vmem:[%s5428_s5 + $0x34] sm:$0xf] }
  0xd0   : > { %1693 = vmatpush.bf16.msrb.mxu0 %v3295_v53  ;;  %1658 = vmatmul.bf16.vlgmr.msra.gmra.mxu1 %v5567_v34  ;;  %v4478_v45 = vld [vmem:[%s5428_s5 + $0x364] sm:$0xf]  ;;  %v3580_v46 = vld [vmem:[%s5428_s5 + $0x378] sm:$0xf0]  ;;  %v3391_v50 = vor.u32 %v4430_v42, %v3388_v44  ;;  %v3172_v53 = vld [vmem:[%s5428_s5 + $0x48] sm:$0xf0] }
  0xd1   : > { %1707 = vmatpush.bf16.msrb.mxu1 %v3487_v54  ;;  %v4526_v47 = vld [vmem:[%s5428_s5 + $0x4e4] sm:$0xf]  ;;  %v3772_v48 = vld [vmem:[%s5428_s5 + $0x4f8] sm:$0xf0]  ;;  %v3583_v51 = vor.u32 %v4478_v45, %v3580_v46  ;;  %v4424_v54 = vld [vmem:[%s5428_s5 + $0x1b4] sm:$0xf]  ;;  %v3175_v61 = vor.u32 %v4376_v52, %v3172_v53 }
  0xd2   : > { %1721 = vmatpush.bf16.msrb.mxu2 %v3679_v55  ;;  %v3775_v55 = vor.u32 %v4526_v47, %v3772_v48  ;;  %v3364_v56 = vld [vmem:[%s5428_s5 + $0x1c8] sm:$0xf0]  ;;  %v4472_v57 = vld [vmem:[%s5428_s5 + $0x334] sm:$0xf]  ;;  %v4370_v62 = vld [vmem:[%s5428_s5 + $0x4] sm:$0xf] }
  0xd3   : > { %1735 = vmatpush.bf16.msrb.mxu3 %v3871_v59  ;;  %v3556_v58 = vld [vmem:[%s5428_s5 + $0x348] sm:$0xf0]  ;;  %v4520_v59 = vld [vmem:[%s5428_s5 + $0x4b4] sm:$0xf]  ;;  %v3148_v63 = vld [vmem:[%s5428_s5 + $0x18] sm:$0xf0]  ;;  %v3367_v0 = vor.u32 %v4424_v54, %v3364_v56 }
  0xd4   : > { %1694 = vmatpush.bf16.msrb.mxu0 %v3271_v2  ;;  %v3748_v60 = vld [vmem:[%s5428_s5 + $0x4c8] sm:$0xf0]  ;;  %v3559_v1 = vor.u32 %v4472_v57, %v3556_v58  ;;  %v4418_v2 = vld [vmem:[%s5428_s5 + $0x184] sm:$0xf]  ;;  %v3340_v3 = vld [vmem:[%s5428_s5 + $0x198] sm:$0xf0]  ;;  %v3151_v13 = vor.u32 %v4370_v62, %v3148_v63 }
  0xd5   : > { %1708 = vmatpush.bf16.msrb.mxu1 %v3463_v6  ;;  %v4466_v4 = vld [vmem:[%s5428_s5 + $0x304] sm:$0xf]  ;;  %v3751_v5 = vor.u32 %v4520_v59, %v3748_v60  ;;  %v3532_v6 = vld [vmem:[%s5428_s5 + $0x318] sm:$0xf0]  ;;  %v3322_v10 = vld [vmem:[%s5428_s5 + $0x158] sm:$0xf]  ;;  %v3343_v18 = vor.u32 %v4418_v2, %v3340_v3 }
  0xd6   : > { %1722 = vmatpush.bf16.msrb.mxu2 %v3655_v7  ;;  %v4514_v7 = vld [vmem:[%s5428_s5 + $0x484] sm:$0xf]  ;;  %v3724_v8 = vld [vmem:[%s5428_s5 + $0x498] sm:$0xf0]  ;;  %v4416_v11 = vld [vmem:[%s5428_s5 + $0x16c] sm:$0xf0]  ;;  %v3535_v19 = vor.u32 %v4466_v4, %v3532_v6 }
  0xd7   : > { %1736 = vmatpush.bf16.msrb.mxu3 %v3847_v12  ;;  %v3514_v12 = vld [vmem:[%s5428_s5 + $0x2d8] sm:$0xf]  ;;  %v4464_v14 = vld [vmem:[%s5428_s5 + $0x2ec] sm:$0xf0]  ;;  %v3727_v22 = vor.u32 %v4514_v7, %v3724_v8  ;;  %v3323_v23 = vor.u32 %v4416_v11, %v3322_v10  ;;  %v3298_v26 = vld [vmem:[%s5428_s5 + $0x128] sm:$0xf] }
  0xd8   : > { %1695 = vmatpush.bf16.msrb.mxu0 %v3247_v20  ;;  %v3706_v15 = vld [vmem:[%s5428_s5 + $0x458] sm:$0xf]  ;;  %v4512_v17 = vld [vmem:[%s5428_s5 + $0x46c] sm:$0xf0]  ;;  %v4410_v28 = vld [vmem:[%s5428_s5 + $0x13c] sm:$0xf0] }
  0xd9   : > { %1709 = vmatpush.bf16.msrb.mxu1 %v3439_v24  ;;  %v3898_v20 = vld [vmem:[%s5428_s5 + $0x5d8] sm:$0xf]  ;;  %v4560_v21 = vld [vmem:[%s5428_s5 + $0x5ec] sm:$0xf0]  ;;  %v3515_v24 = vor.u32 %v4464_v14, %v3514_v12  ;;  %v3490_v29 = vld [vmem:[%s5428_s5 + $0x2a8] sm:$0xf] }
  0xda   : > { %1723 = vmatpush.bf16.msrb.mxu2 %v3631_v25  ;;  %v3707_v25 = vor.u32 %v4512_v17, %v3706_v15  ;;  %v4458_v31 = vld [vmem:[%s5428_s5 + $0x2bc] sm:$0xf0]  ;;  %v3682_v32 = vld [vmem:[%s5428_s5 + $0x428] sm:$0xf]  ;;  %v3274_v40 = vld [vmem:[%s5428_s5 + $0xf8] sm:$0xf] }
  0xdb   : > { %1737 = vmatpush.bf16.msrb.mxu3 %v3823_v30  ;;  %v3899_v30 = vor.u32 %v4560_v21, %v3898_v20  ;;  %v4506_v33 = vld [vmem:[%s5428_s5 + $0x43c] sm:$0xf0]  ;;  %v3874_v35 = vld [vmem:[%s5428_s5 + $0x5a8] sm:$0xf]  ;;  %v4404_v41 = vld [vmem:[%s5428_s5 + $0x10c] sm:$0xf0] }
  0xdc   : > { %1696 = vmatpush.bf16.msrb.mxu0 %v3223_v37  ;;  %v4554_v36 = vld [vmem:[%s5428_s5 + $0x5bc] sm:$0xf0]  ;;  %v3299_v37 = vor.u32 %v4410_v28, %v3298_v26  ;;  %v3466_v42 = vld [vmem:[%s5428_s5 + $0x278] sm:$0xf]  ;;  %v4452_v44 = vld [vmem:[%s5428_s5 + $0x28c] sm:$0xf0] }
  0xdd   : > { %1710 = vmatpush.bf16.msrb.mxu1 %v3415_v38  ;;  %v3491_v38 = vor.u32 %v4458_v31, %v3490_v29  ;;  %v3658_v45 = vld [vmem:[%s5428_s5 + $0x3f8] sm:$0xf]  ;;  %v4500_v46 = vld [vmem:[%s5428_s5 + $0x40c] sm:$0xf0]  ;;  %v3250_v52 = vld [vmem:[%s5428_s5 + $0xc8] sm:$0xf] }
  0xde   : > { %1724 = vmatpush.bf16.msrb.mxu2 %v3607_v39  ;;  %v3683_v39 = vor.u32 %v4506_v33, %v3682_v32  ;;  %v3850_v47 = vld [vmem:[%s5428_s5 + $0x578] sm:$0xf]  ;;  %v4548_v48 = vld [vmem:[%s5428_s5 + $0x58c] sm:$0xf0]  ;;  %v4398_v53 = vld [vmem:[%s5428_s5 + $0xdc] sm:$0xf0] }
  0xdf   : > { %1738 = vmatpush.bf16.msrb.mxu3 %v3799_v43  ;;  %v3875_v43 = vor.u32 %v4554_v36, %v3874_v35  ;;  %v3442_v54 = vld [vmem:[%s5428_s5 + $0x248] sm:$0xf]  ;;  %v4446_v56 = vld [vmem:[%s5428_s5 + $0x25c] sm:$0xf0]  ;;  %v3418_v2 = vld [vmem:[%s5428_s5 + $0x218] sm:$0xf] }
  0xe0   : > { %1697 = vmatpush.bf16.msrb.mxu0 %v3199_v49  ;;  %v3275_v49 = vor.u32 %v4404_v41, %v3274_v40  ;;  %v3634_v57 = vld [vmem:[%s5428_s5 + $0x3c8] sm:$0xf]  ;;  %v4494_v58 = vld [vmem:[%s5428_s5 + $0x3dc] sm:$0xf0]  ;;  %v3443_v62 = vor.u32 %v4446_v56, %v3442_v54  ;;  %v4440_v4 = vld [vmem:[%s5428_s5 + $0x22c] sm:$0xf0] }
  0xe1   : > { %1711 = vmatpush.bf16.msrb.mxu1 %v3391_v50  ;;  %v3467_v50 = vor.u32 %v4452_v44, %v3466_v42  ;;  %v3826_v59 = vld [vmem:[%s5428_s5 + $0x548] sm:$0xf]  ;;  %v4542_v60 = vld [vmem:[%s5428_s5 + $0x55c] sm:$0xf0]  ;;  %v3635_v63 = vor.u32 %v4494_v58, %v3634_v57  ;;  %v4488_v6 = vld [vmem:[%s5428_s5 + $0x3ac] sm:$0xf0]  ;;  %v3419_v11 = vor.u32 %v4440_v4, %v3418_v2 }
  0xe2   : > { %1725 = vmatpush.bf16.msrb.mxu2 %v3583_v51  ;;  %v3659_v51 = vor.u32 %v4500_v46, %v3658_v45  ;;  %v3827_v3 = vor.u32 %v4542_v60, %v3826_v59  ;;  %v3802_v7 = vld [vmem:[%s5428_s5 + $0x518] sm:$0xf]  ;;  %v4536_v8 = vld [vmem:[%s5428_s5 + $0x52c] sm:$0xf0]  ;;  %v4386_v14 = vld [vmem:[%s5428_s5 + $0x7c] sm:$0xf0] }
  0xe3   : > { %1739 = vmatpush.bf16.msrb.mxu3 %v3775_v55  ;;  %v3851_v55 = vor.u32 %v4548_v48, %v3850_v47  ;;  %v3394_v15 = vld [vmem:[%s5428_s5 + $0x1e8] sm:$0xf]  ;;  %v3803_v17 = vor.u32 %v4536_v8, %v3802_v7  ;;  %v4482_v20 = vld [vmem:[%s5428_s5 + $0x37c] sm:$0xf0]  ;;  %v3178_v26 = vld [vmem:[%s5428_s5 + $0x38] sm:$0xf] }
  0xe4   : > { %1698 = vmatpush.bf16.msrb.mxu0 %v3175_v61  ;;  %v3251_v61 = vor.u32 %v4398_v53, %v3250_v52  ;;  %v3778_v21 = vld [vmem:[%s5428_s5 + $0x4e8] sm:$0xf]  ;;  %v4380_v28 = vld [vmem:[%s5428_s5 + $0x4c] sm:$0xf0]  ;;  %v3370_v29 = vld [vmem:[%s5428_s5 + $0x1b8] sm:$0xf] }
  0xe5   : > { %1712 = vmatpush.bf16.msrb.mxu1 %v3367_v0  ;;  %v3226_v0 = vld [vmem:[%s5428_s5 + $0x98] sm:$0xf]  ;;  %v4428_v31 = vld [vmem:[%s5428_s5 + $0x1cc] sm:$0xf0]  ;;  %v3346_v42 = vld [vmem:[%s5428_s5 + $0x188] sm:$0xf] }
  0xe6   : > { %1726 = vmatpush.bf16.msrb.mxu2 %v3559_v1  ;;  %v4392_v1 = vld [vmem:[%s5428_s5 + $0xac] sm:$0xf0]  ;;  %v3562_v32 = vld [vmem:[%s5428_s5 + $0x338] sm:$0xf]  ;;  %v3371_v40 = vor.u32 %v4428_v31, %v3370_v29  ;;  %v3538_v44 = vld [vmem:[%s5428_s5 + $0x308] sm:$0xf] }
  0xe7   : > { %1740 = vmatpush.bf16.msrb.mxu3 %v3751_v5  ;;  %v3610_v5 = vld [vmem:[%s5428_s5 + $0x398] sm:$0xf]  ;;  %v3227_v10 = vor.u32 %v4392_v1, %v3226_v0  ;;  %v4476_v33 = vld [vmem:[%s5428_s5 + $0x34c] sm:$0xf0]  ;;  %v4470_v46 = vld [vmem:[%s5428_s5 + $0x31c] sm:$0xf0] }
  0xe8   : > { %1699 = vmatpush.bf16.msrb.mxu0 %v3151_v13  ;;  %v3611_v12 = vor.u32 %v4488_v6, %v3610_v5  ;;  %v3202_v13 = vld [vmem:[%s5428_s5 + $0x68] sm:$0xf]  ;;  %v3754_v35 = vld [vmem:[%s5428_s5 + $0x4b8] sm:$0xf]  ;;  %v4524_v36 = vld [vmem:[%s5428_s5 + $0x4cc] sm:$0xf0]  ;;  %v3563_v41 = vor.u32 %v4476_v33, %v3562_v32  ;;  %v3539_v57 = vor.u32 %v4470_v46, %v3538_v44 }
  0xe9   : > { %1713 = vmatpush.bf16.msrb.mxu1 %v3343_v18  ;;  %v4434_v18 = vld [vmem:[%s5428_s5 + $0x1fc] sm:$0xf0]  ;;  %v3755_v45 = vor.u32 %v4524_v36, %v3754_v35  ;;  %v3730_v47 = vld [vmem:[%s5428_s5 + $0x488] sm:$0xf]  ;;  %v3516_v53 = vld [vmem:[%s5428_s5 + $0x2f0] sm:$0xf0] }
  0xea   : > { %1727 = vmatpush.bf16.msrb.mxu2 %v3535_v19  ;;  %v3586_v19 = vld [vmem:[%s5428_s5 + $0x368] sm:$0xf]  ;;  %v4518_v48 = vld [vmem:[%s5428_s5 + $0x49c] sm:$0xf0]  ;;  %v4509_v54 = vld [vmem:[%s5428_s5 + $0x45c] sm:$0xf] }
  0xeb   : > { %1741 = vmatpush.bf16.msrb.mxu3 %v3727_v22  ;;  %1700 = vmatmul.bf16.vlgmr.msrb.gmra.mxu0 %v5560_v27  ;;  %v4530_v22 = vld [vmem:[%s5428_s5 + $0x4fc] sm:$0xf0]  ;;  %v4557_v58 = vld [vmem:[%s5428_s5 + $0x5dc] sm:$0xf]  ;;  %v3900_v59 = vld [vmem:[%s5428_s5 + $0x5f0] sm:$0xf0]  ;;  %v3731_v60 = vor.u32 %v4518_v48, %v3730_v47 }
  0xec   : > { %1748 = vmatpush.bf16.msra.mxu0 %v3323_v23  ;;  %1714 = vmatmul.bf16.vlgmr.msrb.gmra.mxu1 %v5567_v34  ;;  %v3203_v23 = vor.u32 %v4386_v14, %v3202_v13  ;;  %v4407_v0 = vld [vmem:[%s5428_s5 + $0x12c] sm:$0xf]  ;;  %v3300_v1 = vld [vmem:[%s5428_s5 + $0x140] sm:$0xf0]  ;;  %v4401_v13 = vld [vmem:[%s5428_s5 + $0xfc] sm:$0xf] }
  0xed   : > { %1762 = vmatpush.bf16.msra.mxu1 %v3515_v24  ;;  %1728 = vmatmul.bf16.vlgmr.msrb.gmra.mxu2 %v5542_v9  ;;  %v3395_v24 = vor.u32 %v4434_v18, %v3394_v15  ;;  %v4455_v2 = vld [vmem:[%s5428_s5 + $0x2ac] sm:$0xf]  ;;  %v3492_v4 = vld [vmem:[%s5428_s5 + $0x2c0] sm:$0xf0]  ;;  %v3276_v14 = vld [vmem:[%s5428_s5 + $0x110] sm:$0xf0] }
  0xee   : > { %1776 = vmatpush.bf16.msra.mxu2 %v3707_v25  ;;  %1742 = vmatmul.bf16.vlgmr.msrb.gmra.mxu3 %v5549_v16  ;;  %v3587_v25 = vor.u32 %v4482_v20, %v3586_v19  ;;  %v4503_v5 = vld [vmem:[%s5428_s5 + $0x42c] sm:$0xf]  ;;  %v3684_v6 = vld [vmem:[%s5428_s5 + $0x440] sm:$0xf0]  ;;  %v4449_v15 = vld [vmem:[%s5428_s5 + $0x27c] sm:$0xf] }
  0xef   : > { %1790 = vmatpush.bf16.msra.mxu3 %v3899_v30  ;;  %v3779_v30 = vor.u32 %v4530_v22, %v3778_v21  ;;  %v4551_v7 = vld [vmem:[%s5428_s5 + $0x5ac] sm:$0xf]  ;;  %v3876_v8 = vld [vmem:[%s5428_s5 + $0x5c0] sm:$0xf0]  ;;  %v3468_v18 = vld [vmem:[%s5428_s5 + $0x290] sm:$0xf0] }
  0xf0   : > { %1749 = vmatpush.bf16.msra.mxu0 %v3299_v37  ;;  %v3179_v37 = vor.u32 %v4380_v28, %v3178_v26  ;;  %v4497_v19 = vld [vmem:[%s5428_s5 + $0x3fc] sm:$0xf]  ;;  %v3660_v20 = vld [vmem:[%s5428_s5 + $0x410] sm:$0xf0]  ;;  %v4395_v26 = vld [vmem:[%s5428_s5 + $0xcc] sm:$0xf] }
  0xf1   : > { %1763 = vmatpush.bf16.msra.mxu1 %v3491_v38  ;;  %v3154_v38 = vld [vmem:[%s5428_s5 + $0x8] sm:$0xf]  ;;  %v4545_v21 = vld [vmem:[%s5428_s5 + $0x57c] sm:$0xf]  ;;  %v3852_v22 = vld [vmem:[%s5428_s5 + $0x590] sm:$0xf0] }
  0xf2   : > { %1777 = vmatpush.bf16.msra.mxu2 %v3683_v39  ;;  %v4374_v39 = vld [vmem:[%s5428_s5 + $0x1c] sm:$0xf0]  ;;  %v3252_v28 = vld [vmem:[%s5428_s5 + $0xe0] sm:$0xf0]  ;;  %v4443_v29 = vld [vmem:[%s5428_s5 + $0x24c] sm:$0xf] }
  0xf3   : > { %1791 = vmatpush.bf16.msra.mxu3 %v3875_v43  ;;  %v4422_v43 = vld [vmem:[%s5428_s5 + $0x19c] sm:$0xf0]  ;;  %v3155_v52 = vor.u32 %v4374_v39, %v3154_v38  ;;  %v3444_v31 = vld [vmem:[%s5428_s5 + $0x260] sm:$0xf0]  ;;  %v4491_v32 = vld [vmem:[%s5428_s5 + $0x3cc] sm:$0xf] }
  0xf4   : > { %1750 = vmatpush.bf16.msra.mxu0 %v3275_v49  ;;  %v4413_v49 = vld [vmem:[%s5428_s5 + $0x15c] sm:$0xf]  ;;  %v3347_v56 = vor.u32 %v4422_v43, %v3346_v42  ;;  %v3636_v33 = vld [vmem:[%s5428_s5 + $0x3e0] sm:$0xf0]  ;;  %v4539_v35 = vld [vmem:[%s5428_s5 + $0x54c] sm:$0xf]  ;;  %v3447_v38 = vor.u32 %v4443_v29, %v3444_v31 }
  0xf5   : > { %1764 = vmatpush.bf16.msra.mxu1 %v3467_v50  ;;  %v3324_v50 = vld [vmem:[%s5428_s5 + $0x170] sm:$0xf0]  ;;  %v3828_v36 = vld [vmem:[%s5428_s5 + $0x560] sm:$0xf0]  ;;  %v3639_v39 = vor.u32 %v4491_v32, %v3636_v33  ;;  %v4437_v42 = vld [vmem:[%s5428_s5 + $0x21c] sm:$0xf] }
  0xf6   : > { %1778 = vmatpush.bf16.msra.mxu2 %v3659_v51  ;;  %v4461_v51 = vld [vmem:[%s5428_s5 + $0x2dc] sm:$0xf]  ;;  %v3831_v43 = vor.u32 %v4539_v35, %v3828_v36  ;;  %v3420_v44 = vld [vmem:[%s5428_s5 + $0x230] sm:$0xf0]  ;;  %v3714_v29 = vld [vmem:[%s5428_s5 + $0x460] sm:$0xf] }
  0xf7   : > { %1792 = vmatpush.bf16.msra.mxu3 %v3851_v55  ;;  %v3708_v55 = vld [vmem:[%s5428_s5 + $0x470] sm:$0xf0]  ;;  %v4533_v47 = vld [vmem:[%s5428_s5 + $0x51c] sm:$0xf]  ;;  %v3906_v33 = vld [vmem:[%s5428_s5 + $0x5e0] sm:$0xf] }
  0xf8   : > { %1751 = vmatpush.bf16.msra.mxu0 %v3251_v61  ;;  %v3327_v61 = vor.u32 %v4413_v49, %v3324_v50  ;;  %v3612_v46 = vld [vmem:[%s5428_s5 + $0x3b0] sm:$0xf0]  ;;  %v3423_v50 = vor.u32 %v4437_v42, %v3420_v44  ;;  %v4561_v35 = vld [vmem:[%s5428_s5 + $0x5f4] sm:$0xf0]  ;;  %v3498_v42 = vld [vmem:[%s5428_s5 + $0x2b0] sm:$0xf] }
  0xf9   : > { %1765 = vmatpush.bf16.msra.mxu1 %v3443_v62  ;;  %v3519_v62 = vor.u32 %v4461_v51, %v3516_v53  ;;  %v3804_v48 = vld [vmem:[%s5428_s5 + $0x530] sm:$0xf0]  ;;  %v3204_v53 = vld [vmem:[%s5428_s5 + $0x80] sm:$0xf0]  ;;  %v4459_v44 = vld [vmem:[%s5428_s5 + $0x2c4] sm:$0xf0] }
  0xfa   : > { %1779 = vmatpush.bf16.msra.mxu2 %v3635_v63  ;;  %v3711_v63 = vor.u32 %v4509_v54, %v3708_v55  ;;  %v4431_v54 = vld [vmem:[%s5428_s5 + $0x1ec] sm:$0xf]  ;;  %v3807_v55 = vor.u32 %v4533_v47, %v3804_v48  ;;  %v3882_v47 = vld [vmem:[%s5428_s5 + $0x5b0] sm:$0xf]  ;;  %v4555_v48 = vld [vmem:[%s5428_s5 + $0x5c4] sm:$0xf0] }
  0xfb   : > { %1793 = vmatpush.bf16.msra.mxu3 %v3827_v3  ;;  %v3903_v3 = vor.u32 %v4557_v58, %v3900_v59  ;;  %v3588_v58 = vld [vmem:[%s5428_s5 + $0x380] sm:$0xf0]  ;;  %v4527_v59 = vld [vmem:[%s5428_s5 + $0x4ec] sm:$0xf] }
  0xfc   : > { %1752 = vmatpush.bf16.msra.mxu0 %v3227_v10  ;;  %v3303_v10 = vor.u32 %v4407_v0, %v3300_v1  ;;  %v4377_v0 = vld [vmem:[%s5428_s5 + $0x3c] sm:$0xf]  ;;  %v3180_v1 = vld [vmem:[%s5428_s5 + $0x50] sm:$0xf0] }
  0xfd   : > { %1766 = vmatpush.bf16.msra.mxu1 %v3419_v11  ;;  %v3495_v11 = vor.u32 %v4455_v2, %v3492_v4  ;;  %v4425_v2 = vld [vmem:[%s5428_s5 + $0x1bc] sm:$0xf]  ;;  %v3372_v4 = vld [vmem:[%s5428_s5 + $0x1d0] sm:$0xf0] }
  0xfe   : > { %1780 = vmatpush.bf16.msra.mxu2 %v3611_v12  ;;  %v3687_v12 = vor.u32 %v4503_v5, %v3684_v6  ;;  %v4473_v5 = vld [vmem:[%s5428_s5 + $0x33c] sm:$0xf]  ;;  %v3564_v6 = vld [vmem:[%s5428_s5 + $0x350] sm:$0xf0] }
  0xff   : > { %1794 = vmatpush.bf16.msra.mxu3 %v3803_v17  ;;  %v3879_v17 = vor.u32 %v4551_v7, %v3876_v8  ;;  %v4521_v7 = vld [vmem:[%s5428_s5 + $0x4bc] sm:$0xf]  ;;  %v3756_v8 = vld [vmem:[%s5428_s5 + $0x4d0] sm:$0xf0] }
 0x100   : > { %1753 = vmatpush.bf16.msra.mxu0 %v3203_v23  ;;  %v3279_v23 = vor.u32 %v4401_v13, %v3276_v14  ;;  %v3375_v13 = vor.u32 %v4425_v2, %v3372_v4  ;;  %v3567_v14 = vor.u32 %v4473_v5, %v3564_v6  ;;  %v3450_v2 = vld [vmem:[%s5428_s5 + $0x250] sm:$0xf]  ;;  %v4447_v4 = vld [vmem:[%s5428_s5 + $0x264] sm:$0xf0] }
 0x101   : > { %1767 = vmatpush.bf16.msra.mxu1 %v3395_v24  ;;  %v3471_v24 = vor.u32 %v4449_v15, %v3468_v18  ;;  %v4419_v15 = vld [vmem:[%s5428_s5 + $0x18c] sm:$0xf]  ;;  %v3642_v5 = vld [vmem:[%s5428_s5 + $0x3d0] sm:$0xf]  ;;  %v4495_v6 = vld [vmem:[%s5428_s5 + $0x3e4] sm:$0xf0] }
 0x102   : > { %1781 = vmatpush.bf16.msra.mxu2 %v3587_v25  ;;  %v3663_v25 = vor.u32 %v4497_v19, %v3660_v20  ;;  %v4467_v18 = vld [vmem:[%s5428_s5 + $0x30c] sm:$0xf]  ;;  %v3759_v19 = vor.u32 %v4521_v7, %v3756_v8  ;;  %v3540_v20 = vld [vmem:[%s5428_s5 + $0x320] sm:$0xf0]  ;;  %v3834_v7 = vld [vmem:[%s5428_s5 + $0x550] sm:$0xf] }
 0x103   : > { %1795 = vmatpush.bf16.msra.mxu3 %v3779_v30  ;;  %v3855_v30 = vor.u32 %v4545_v21, %v3852_v22  ;;  %v4515_v21 = vld [vmem:[%s5428_s5 + $0x48c] sm:$0xf]  ;;  %v3732_v22 = vld [vmem:[%s5428_s5 + $0x4a0] sm:$0xf0]  ;;  %v3543_v32 = vor.u32 %v4467_v18, %v3540_v20  ;;  %v4543_v8 = vld [vmem:[%s5428_s5 + $0x564] sm:$0xf0] }
 0x104   : > { %1754 = vmatpush.bf16.msra.mxu0 %v3179_v37  ;;  %v3255_v37 = vor.u32 %v4395_v26, %v3252_v28  ;;  %v4465_v28 = vld [vmem:[%s5428_s5 + $0x2f4] sm:$0xf0]  ;;  %v3735_v36 = vor.u32 %v4515_v21, %v3732_v22  ;;  %v3810_v21 = vld [vmem:[%s5428_s5 + $0x520] sm:$0xf] }
 0x105   : > { %1768 = vmatpush.bf16.msra.mxu1 %v3371_v40  ;;  %v4389_v40 = vld [vmem:[%s5428_s5 + $0x9c] sm:$0xf]  ;;  %v4441_v18 = vld [vmem:[%s5428_s5 + $0x234] sm:$0xf0] }
 0x106   : > { %1782 = vmatpush.bf16.msra.mxu2 %v3563_v41  ;;  %v3228_v41 = vld [vmem:[%s5428_s5 + $0xb0] sm:$0xf0]  ;;  %v4489_v20 = vld [vmem:[%s5428_s5 + $0x3b4] sm:$0xf0] }
 0x107   : > { %1796 = vmatpush.bf16.msra.mxu3 %v3755_v45  ;;  %v4485_v45 = vld [vmem:[%s5428_s5 + $0x39c] sm:$0xf]  ;;  %v3231_v49 = vor.u32 %v4389_v40, %v3228_v41  ;;  %v3306_v40 = vld [vmem:[%s5428_s5 + $0x130] sm:$0xf]  ;;  %v4411_v41 = vld [vmem:[%s5428_s5 + $0x144] sm:$0xf0] }
 0x108   : > { %1755 = vmatpush.bf16.msra.mxu0 %v3155_v52  ;;  %v3615_v51 = vor.u32 %v4485_v45, %v3612_v46  ;;  %v4383_v52 = vld [vmem:[%s5428_s5 + $0x6c] sm:$0xf]  ;;  %v3690_v45 = vld [vmem:[%s5428_s5 + $0x430] sm:$0xf]  ;;  %v4507_v46 = vld [vmem:[%s5428_s5 + $0x444] sm:$0xf0] }
 0x109   : > { %1769 = vmatpush.bf16.msra.mxu1 %v3347_v56  ;;  %v3396_v56 = vld [vmem:[%s5428_s5 + $0x200] sm:$0xf0]  ;;  %v4537_v22 = vld [vmem:[%s5428_s5 + $0x534] sm:$0xf0] }
 0x10a   : > { %1783 = vmatpush.bf16.msra.mxu2 %v3539_v57  ;;  %v4479_v57 = vld [vmem:[%s5428_s5 + $0x36c] sm:$0xf] }
 0x10b   : > { %1797 = vmatpush.bf16.msra.mxu3 %v3731_v60  ;;  %1756 = vmatmul.bf16.vlgmr.msra.gmra.mxu0 %v5560_v27  ;;  %v3780_v60 = vld [vmem:[%s5428_s5 + $0x500] sm:$0xf0] }
 0x10c   : > { %1804 = vmatpush.bf16.msrb.mxu0 %v3327_v61  ;;  %1770 = vmatmul.bf16.vlgmr.msra.gmra.mxu1 %v5567_v34  ;;  %v3207_v61 = vor.u32 %v4383_v52, %v3204_v53  ;;  %v3282_v52 = vld [vmem:[%s5428_s5 + $0x100] sm:$0xf]  ;;  %v4405_v53 = vld [vmem:[%s5428_s5 + $0x114] sm:$0xf0] }
 0x10d   : > { %1818 = vmatpush.bf16.msrb.mxu1 %v3519_v62  ;;  %1784 = vmatmul.bf16.vlgmr.msra.gmra.mxu2 %v5542_v9  ;;  %v3399_v62 = vor.u32 %v4431_v54, %v3396_v56  ;;  %v3474_v54 = vld [vmem:[%s5428_s5 + $0x280] sm:$0xf]  ;;  %v4453_v56 = vld [vmem:[%s5428_s5 + $0x294] sm:$0xf0] }
 0x10e   : > { %1832 = vmatpush.bf16.msrb.mxu2 %v3711_v63  ;;  %1798 = vmatmul.bf16.vlgmr.msra.gmra.mxu3 %v5549_v16  ;;  %v3591_v63 = vor.u32 %v4479_v57, %v3588_v58  ;;  %v3666_v57 = vld [vmem:[%s5428_s5 + $0x400] sm:$0xf]  ;;  %v4501_v58 = vld [vmem:[%s5428_s5 + $0x414] sm:$0xf0] }
 0x10f   : > { %1846 = vmatpush.bf16.msrb.mxu3 %v3903_v3  ;;  %v3783_v3 = vor.u32 %v4527_v59, %v3780_v60  ;;  %v3858_v59 = vld [vmem:[%s5428_s5 + $0x580] sm:$0xf]  ;;  %v4549_v60 = vld [vmem:[%s5428_s5 + $0x594] sm:$0xf0] }
 0x110   : > { %1805 = vmatpush.bf16.msrb.mxu0 %v3303_v10  ;;  %v3183_v10 = vor.u32 %v4377_v0, %v3180_v1  ;;  %v3258_v0 = vld [vmem:[%s5428_s5 + $0xd0] sm:$0xf]  ;;  %v4399_v1 = vld [vmem:[%s5428_s5 + $0xe4] sm:$0xf0] }
 0x111   : > { %1819 = vmatpush.bf16.msrb.mxu1 %v3495_v11  ;;  %v4371_v11 = vld [vmem:[%s5428_s5 + $0xc] sm:$0xf] }
 0x112   : > { %1833 = vmatpush.bf16.msrb.mxu2 %v3687_v12  ;;  %v3156_v12 = vld [vmem:[%s5428_s5 + $0x20] sm:$0xf0] }
 0x113   : > { %1847 = vmatpush.bf16.msrb.mxu3 %v3879_v17  ;;  %v3348_v17 = vld [vmem:[%s5428_s5 + $0x1a0] sm:$0xf0]  ;;  %v3159_v26 = vor.u32 %v4371_v11, %v3156_v12  ;;  %v3451_v11 = vor.u32 %v4447_v4, %v3450_v2  ;;  %v3643_v12 = vor.u32 %v4495_v6, %v3642_v5 }
 0x114   : > { %1806 = vmatpush.bf16.msrb.mxu0 %v3279_v23  ;;  %v3330_v23 = vld [vmem:[%s5428_s5 + $0x160] sm:$0xf]  ;;  %v3351_v31 = vor.u32 %v4419_v15, %v3348_v17  ;;  %v3835_v17 = vor.u32 %v4543_v8, %v3834_v7  ;;  %v4510_v2 = vld [vmem:[%s5428_s5 + $0x464] sm:$0xf]  ;;  %v3908_v7 = vld [vmem:[%s5428_s5 + $0x5f8] sm:$0xf0] }
 0x115   : > { %1820 = vmatpush.bf16.msrb.mxu1 %v3471_v24  ;;  %v4417_v24 = vld [vmem:[%s5428_s5 + $0x174] sm:$0xf0]  ;;  %v3426_v15 = vld [vmem:[%s5428_s5 + $0x220] sm:$0xf]  ;;  %v4558_v6 = vld [vmem:[%s5428_s5 + $0x5e4] sm:$0xf] }
 0x116   : > { %1834 = vmatpush.bf16.msrb.mxu2 %v3663_v25  ;;  %v3522_v25 = vld [vmem:[%s5428_s5 + $0x2e0] sm:$0xf] }
 0x117   : > { %1848 = vmatpush.bf16.msrb.mxu3 %v3855_v30  ;;  %v4513_v30 = vld [vmem:[%s5428_s5 + $0x474] sm:$0xf0] }
 0x118   : > { %1807 = vmatpush.bf16.msrb.mxu0 %v3255_v37  ;;  %v3331_v37 = vor.u32 %v4417_v24, %v3330_v23  ;;  %v3427_v24 = vor.u32 %v4441_v18, %v3426_v15  ;;  %v4456_v15 = vld [vmem:[%s5428_s5 + $0x2b4] sm:$0xf]  ;;  %v3500_v18 = vld [vmem:[%s5428_s5 + $0x2c8] sm:$0xf0] }
 0x119   : > { %1821 = vmatpush.bf16.msrb.mxu1 %v3447_v38  ;;  %v3523_v38 = vor.u32 %v4465_v28, %v3522_v25  ;;  %v4387_v28 = vld [vmem:[%s5428_s5 + $0x84] sm:$0xf0] }
 0x11a   : > { %1835 = vmatpush.bf16.msrb.mxu2 %v3639_v39  ;;  %v3715_v39 = vor.u32 %v4513_v30, %v3714_v29  ;;  %v3402_v29 = vld [vmem:[%s5428_s5 + $0x1f0] sm:$0xf]  ;;  %v3811_v30 = vor.u32 %v4537_v22, %v3810_v21  ;;  %v4552_v21 = vld [vmem:[%s5428_s5 + $0x5b4] sm:$0xf]  ;;  %v3884_v22 = vld [vmem:[%s5428_s5 + $0x5c8] sm:$0xf0] }
 0x11b   : > { %1849 = vmatpush.bf16.msrb.mxu3 %v3831_v43  ;;  %v3907_v43 = vor.u32 %v4561_v35, %v3906_v33  ;;  %v4483_v33 = vld [vmem:[%s5428_s5 + $0x384] sm:$0xf0]  ;;  %v3786_v35 = vld [vmem:[%s5428_s5 + $0x4f0] sm:$0xf] }
 0x11c   : > { %1808 = vmatpush.bf16.msrb.mxu0 %v3231_v49  ;;  %v3307_v49 = vor.u32 %v4411_v41, %v3306_v40  ;;  %v3186_v40 = vld [vmem:[%s5428_s5 + $0x40] sm:$0xf]  ;;  %v4381_v41 = vld [vmem:[%s5428_s5 + $0x54] sm:$0xf0] }
 0x11d   : > { %1822 = vmatpush.bf16.msrb.mxu1 %v3423_v50  ;;  %v3499_v50 = vor.u32 %v4459_v44, %v3498_v42  ;;  %v3378_v42 = vld [vmem:[%s5428_s5 + $0x1c0] sm:$0xf]  ;;  %v4429_v44 = vld [vmem:[%s5428_s5 + $0x1d4] sm:$0xf0] }
 0x11e   : > { %1836 = vmatpush.bf16.msrb.mxu2 %v3615_v51  ;;  %v3691_v51 = vor.u32 %v4507_v46, %v3690_v45  ;;  %v3570_v45 = vld [vmem:[%s5428_s5 + $0x340] sm:$0xf]  ;;  %v4477_v46 = vld [vmem:[%s5428_s5 + $0x354] sm:$0xf0] }
 0x11f   : > { %1850 = vmatpush.bf16.msrb.mxu3 %v3807_v55  ;;  %v3883_v55 = vor.u32 %v4555_v48, %v3882_v47  ;;  %v3762_v47 = vld [vmem:[%s5428_s5 + $0x4c0] sm:$0xf]  ;;  %v4525_v48 = vld [vmem:[%s5428_s5 + $0x4d4] sm:$0xf0] }
 0x120   : > { %1809 = vmatpush.bf16.msrb.mxu0 %v3207_v61  ;;  %v3283_v61 = vor.u32 %v4405_v53, %v3282_v52  ;;  %v3379_v52 = vor.u32 %v4429_v44, %v3378_v42  ;;  %v3571_v53 = vor.u32 %v4477_v46, %v3570_v45  ;;  %v4444_v42 = vld [vmem:[%s5428_s5 + $0x254] sm:$0xf]  ;;  %v3452_v44 = vld [vmem:[%s5428_s5 + $0x268] sm:$0xf0] }
 0x121   : > { %1823 = vmatpush.bf16.msrb.mxu1 %v3399_v62  ;;  %v3475_v62 = vor.u32 %v4453_v56, %v3474_v54  ;;  %v3354_v54 = vld [vmem:[%s5428_s5 + $0x190] sm:$0xf]  ;;  %v4492_v45 = vld [vmem:[%s5428_s5 + $0x3d4] sm:$0xf]  ;;  %v3644_v46 = vld [vmem:[%s5428_s5 + $0x3e8] sm:$0xf0] }
 0x122   : > { %1837 = vmatpush.bf16.msrb.mxu2 %v3591_v63  ;;  %v3667_v63 = vor.u32 %v4501_v58, %v3666_v57  ;;  %v3546_v56 = vld [vmem:[%s5428_s5 + $0x310] sm:$0xf]  ;;  %v3763_v57 = vor.u32 %v4525_v48, %v3762_v47  ;;  %v4471_v58 = vld [vmem:[%s5428_s5 + $0x324] sm:$0xf0]  ;;  %v4540_v47 = vld [vmem:[%s5428_s5 + $0x554] sm:$0xf] }
 0x123   : > { %1851 = vmatpush.bf16.msrb.mxu3 %v3783_v3  ;;  %v3859_v3 = vor.u32 %v4549_v60, %v3858_v59  ;;  %v3738_v59 = vld [vmem:[%s5428_s5 + $0x490] sm:$0xf]  ;;  %v4519_v60 = vld [vmem:[%s5428_s5 + $0x4a4] sm:$0xf0]  ;;  %v3547_v5 = vor.u32 %v4471_v58, %v3546_v56  ;;  %v3836_v48 = vld [vmem:[%s5428_s5 + $0x568] sm:$0xf0] }
 0x124   : > { %1810 = vmatpush.bf16.msrb.mxu0 %v3183_v10  ;;  %v3259_v10 = vor.u32 %v4399_v1, %v3258_v0  ;;  %v3524_v1 = vld [vmem:[%s5428_s5 + $0x2f8] sm:$0xf0]  ;;  %v3739_v8 = vor.u32 %v4519_v60, %v3738_v59  ;;  %v4534_v59 = vld [vmem:[%s5428_s5 + $0x524] sm:$0xf] }
 0x125   : > { %1824 = vmatpush.bf16.msrb.mxu1 %v3375_v13  ;;  %v3234_v13 = vld [vmem:[%s5428_s5 + $0xa0] sm:$0xf]  ;;  %v3428_v56 = vld [vmem:[%s5428_s5 + $0x238] sm:$0xf0] }
 0x126   : > { %1838 = vmatpush.bf16.msrb.mxu2 %v3567_v14  ;;  %v4393_v14 = vld [vmem:[%s5428_s5 + $0xb4] sm:$0xf0]  ;;  %v3620_v58 = vld [vmem:[%s5428_s5 + $0x3b8] sm:$0xf0] }
 0x127   : > { %1852 = vmatpush.bf16.msrb.mxu3 %v3759_v19  ;;  %v3618_v19 = vld [vmem:[%s5428_s5 + $0x3a0] sm:$0xf]  ;;  %v3235_v23 = vor.u32 %v4393_v14, %v3234_v13  ;;  %v4408_v13 = vld [vmem:[%s5428_s5 + $0x134] sm:$0xf]  ;;  %v3308_v14 = vld [vmem:[%s5428_s5 + $0x148] sm:$0xf0] }
 0x128   : > { %1811 = vmatpush.bf16.msrb.mxu0 %v3159_v26  ;;  %v3619_v25 = vor.u32 %v4489_v20, %v3618_v19  ;;  %v3210_v26 = vld [vmem:[%s5428_s5 + $0x70] sm:$0xf]  ;;  %v4504_v19 = vld [vmem:[%s5428_s5 + $0x434] sm:$0xf]  ;;  %v3692_v20 = vld [vmem:[%s5428_s5 + $0x448] sm:$0xf0] }
 0x129   : > { %1825 = vmatpush.bf16.msrb.mxu1 %v3351_v31  ;;  %v4435_v31 = vld [vmem:[%s5428_s5 + $0x204] sm:$0xf0]  ;;  %v3812_v60 = vld [vmem:[%s5428_s5 + $0x538] sm:$0xf0] }
 0x12a   : > { %1839 = vmatpush.bf16.msrb.mxu2 %v3543_v32  ;;  %v3594_v32 = vld [vmem:[%s5428_s5 + $0x370] sm:$0xf] }
 0x12b   : > { %1853 = vmatpush.bf16.msrb.mxu3 %v3735_v36  ;;  %1812 = vmatmul.bf16.vlgmr.msrb.gmra.mxu0 %v5560_v27  ;;  %v4531_v36 = vld [vmem:[%s5428_s5 + $0x504] sm:$0xf0] }
 0x12c   : > { %1860 = vmatpush.bf16.msra.mxu0 %v3331_v37  ;;  %1826 = vmatmul.bf16.vlgmr.msrb.gmra.mxu1 %v5567_v34  ;;  %v3211_v37 = vor.u32 %v4387_v28, %v3210_v26  ;;  %v4402_v26 = vld [vmem:[%s5428_s5 + $0x104] sm:$0xf]  ;;  %v3284_v28 = vld [vmem:[%s5428_s5 + $0x118] sm:$0xf0] }
 0x12d   : > { %1874 = vmatpush.bf16.msra.mxu1 %v3523_v38  ;;  %1840 = vmatmul.bf16.vlgmr.msrb.gmra.mxu2 %v5542_v9  ;;  %v3403_v38 = vor.u32 %v4435_v31, %v3402_v29  ;;  %v4450_v29 = vld [vmem:[%s5428_s5 + $0x284] sm:$0xf]  ;;  %v3476_v31 = vld [vmem:[%s5428_s5 + $0x298] sm:$0xf0] }
 0x12e   : > { %1888 = vmatpush.bf16.msra.mxu2 %v3715_v39  ;;  %1854 = vmatmul.bf16.vlgmr.msrb.gmra.mxu3 %v5549_v16  ;;  %v3595_v39 = vor.u32 %v4483_v33, %v3594_v32  ;;  %v4498_v32 = vld [vmem:[%s5428_s5 + $0x404] sm:$0xf]  ;;  %v3668_v33 = vld [vmem:[%s5428_s5 + $0x418] sm:$0xf0] }
 0x12f   : > { %1902 = vmatpush.bf16.msra.mxu3 %v3907_v43  ;;  %v3787_v43 = vor.u32 %v4531_v36, %v3786_v35  ;;  %v4546_v35 = vld [vmem:[%s5428_s5 + $0x584] sm:$0xf]  ;;  %v3860_v36 = vld [vmem:[%s5428_s5 + $0x598] sm:$0xf0] }
 0x130   : > { %1861 = vmatpush.bf16.msra.mxu0 %v3307_v49  ;;  %v3187_v49 = vor.u32 %v4381_v41, %v3186_v40  ;;  %v4396_v40 = vld [vmem:[%s5428_s5 + $0xd4] sm:$0xf]  ;;  %v3260_v41 = vld [vmem:[%s5428_s5 + $0xe8] sm:$0xf0] }
 0x131   : > { %1875 = vmatpush.bf16.msra.mxu1 %v3499_v50  ;;  %v3162_v50 = vld [vmem:[%s5428_s5 + $0x10] sm:$0xf] }
 0x132   : > { %1889 = vmatpush.bf16.msra.mxu2 %v3691_v51  ;;  %v4375_v51 = vld [vmem:[%s5428_s5 + $0x24] sm:$0xf0] }
 0x133   : > { %1903 = vmatpush.bf16.msra.mxu3 %v3883_v55  ;;  %v4423_v55 = vld [vmem:[%s5428_s5 + $0x1a4] sm:$0xf0]  ;;  %v3163_v0 = vor.u32 %v4375_v51, %v3162_v50  ;;  %v3455_v50 = vor.u32 %v4444_v42, %v3452_v44  ;;  %v3647_v51 = vor.u32 %v4492_v45, %v3644_v46  ;;  %v3740_v44 = vld [vmem:[%s5428_s5 + $0x4a8] sm:$0xf0] }
 0x134   : > { %1862 = vmatpush.bf16.msra.mxu0 %v3283_v61  ;;  %v4414_v61 = vld [vmem:[%s5428_s5 + $0x164] sm:$0xf]  ;;  %v3355_v4 = vor.u32 %v4423_v55, %v3354_v54  ;;  %v3839_v55 = vor.u32 %v4540_v47, %v3836_v48 }
 0x135   : > { %1876 = vmatpush.bf16.msra.mxu1 %v3475_v62  ;;  %v3332_v62 = vld [vmem:[%s5428_s5 + $0x178] sm:$0xf0]  ;;  %v4438_v54 = vld [vmem:[%s5428_s5 + $0x224] sm:$0xf] }
 0x136   : > { %1890 = vmatpush.bf16.msra.mxu2 %v3667_v63  ;;  %v4462_v63 = vld [vmem:[%s5428_s5 + $0x2e4] sm:$0xf] }
 0x137   : > { %1904 = vmatpush.bf16.msra.mxu3 %v3859_v3  ;;  %v3716_v3 = vld [vmem:[%s5428_s5 + $0x478] sm:$0xf0] }
 0x138   : > { %1863 = vmatpush.bf16.msra.mxu0 %v3259_v10  ;;  %v3335_v10 = vor.u32 %v4414_v61, %v3332_v62  ;;  %v3431_v62 = vor.u32 %v4438_v54, %v3428_v56  ;;  %v454_v56 = vld [vmem:[#allocation2 + $0x8] sm:$0xff] }
 0x139   : > { %1877 = vmatpush.bf16.msra.mxu1 %v3451_v11  ;;  %v3527_v11 = vor.u32 %v4462_v63, %v3524_v1  ;;  %v3212_v1 = vld [vmem:[%s5428_s5 + $0x88] sm:$0xf0] }
 0x13a   : > { %1891 = vmatpush.bf16.msra.mxu2 %v3643_v12  ;;  %v3719_v12 = vor.u32 %v4510_v2, %v3716_v3  ;;  %v4432_v2 = vld [vmem:[%s5428_s5 + $0x1f4] sm:$0xf]  ;;  %v3815_v3 = vor.u32 %v4534_v59, %v3812_v60 }
 0x13b   : > { %1905 = vmatpush.bf16.msra.mxu3 %v3835_v17  ;;  %v3911_v17 = vor.u32 %v4558_v6, %v3908_v7  ;;  %v3596_v6 = vld [vmem:[%s5428_s5 + $0x388] sm:$0xf0]  ;;  %v4528_v7 = vld [vmem:[%s5428_s5 + $0x4f4] sm:$0xf] }
 0x13c   : > { %1864 = vmatpush.bf16.msra.mxu0 %v3235_v23  ;;  %v3311_v23 = vor.u32 %v4408_v13, %v3308_v14  ;;  %v4378_v14 = vld [vmem:[%s5428_s5 + $0x44] sm:$0xf] }
 0x13d   : > { %1878 = vmatpush.bf16.msra.mxu1 %v3427_v24  ;;  %v3503_v24 = vor.u32 %v4456_v15, %v3500_v18  ;;  %v3188_v15 = vld [vmem:[%s5428_s5 + $0x58] sm:$0xf0] }
 0x13e   : > { %1892 = vmatpush.bf16.msra.mxu2 %v3619_v25  ;;  %v3695_v25 = vor.u32 %v4504_v19, %v3692_v20  ;;  %v3380_v20 = vld [vmem:[%s5428_s5 + $0x1d8] sm:$0xf0] }
 0x13f   : > { %1906 = vmatpush.bf16.msra.mxu3 %v3811_v30  ;;  %v3887_v30 = vor.u32 %v4552_v21, %v3884_v22  ;;  %v4474_v21 = vld [vmem:[%s5428_s5 + $0x344] sm:$0xf]  ;;  %v3572_v22 = vld [vmem:[%s5428_s5 + $0x358] sm:$0xf0] }
 0x140   : > { %1865 = vmatpush.bf16.msra.mxu0 %v3211_v37  ;;  %v3287_v37 = vor.u32 %v4402_v26, %v3284_v28  ;;  %v3764_v26 = vld [vmem:[%s5428_s5 + $0x4d8] sm:$0xf0] }
 0x141   : > { %1879 = vmatpush.bf16.msra.mxu1 %v3403_v38  ;;  %v3479_v38 = vor.u32 %v4450_v29, %v3476_v31  ;;  %v3191_v29 = vor.u32 %v4378_v14, %v3188_v15 }
 0x142   : > { %1893 = vmatpush.bf16.msra.mxu2 %v3595_v39  ;;  %v3671_v39 = vor.u32 %v4498_v32, %v3668_v33  ;;  %v3575_v33 = vor.u32 %v4474_v21, %v3572_v22 }
 0x143   : > { %1907 = vmatpush.bf16.msra.mxu3 %v3787_v43  ;;  %v3863_v43 = vor.u32 %v4546_v35, %v3860_v36  ;;  %v3164_v35 = vld [vmem:[%s5428_s5 + $0x28] sm:$0xf0]  ;;  %v4420_v36 = vld [vmem:[%s5428_s5 + $0x194] sm:$0xf] }
 0x144   : > { %1866 = vmatpush.bf16.msra.mxu0 %v3187_v49  ;;  %v3263_v49 = vor.u32 %v4396_v40, %v3260_v41  ;;  %v4468_v40 = vld [vmem:[%s5428_s5 + $0x314] sm:$0xf]  ;;  %v3548_v41 = vld [vmem:[%s5428_s5 + $0x328] sm:$0xf0] }
 0x145   : > { %1880 = vmatpush.bf16.msra.mxu1 %v3379_v52  ;;  %v4390_v52 = vld [vmem:[%s5428_s5 + $0xa4] sm:$0xf] }
 0x146   : > { %1894 = vmatpush.bf16.msra.mxu2 %v3571_v53  ;;  %v3236_v53 = vld [vmem:[%s5428_s5 + $0xb8] sm:$0xf0] }
 0x147   : > { %1908 = vmatpush.bf16.msra.mxu3 %v3763_v57  ;;  %v4486_v57 = vld [vmem:[%s5428_s5 + $0x3a4] sm:$0xf]  ;;  %v3239_v61 = vor.u32 %v4390_v52, %v3236_v53 }
 0x148   : > { %1867 = vmatpush.bf16.msra.mxu0 %v3163_v0  ;;  %v3623_v63 = vor.u32 %v4486_v57, %v3620_v58  ;;  %v4384_v0 = vld [vmem:[%s5428_s5 + $0x74] sm:$0xf] }
 0x149   : > { %1881 = vmatpush.bf16.msra.mxu1 %v3355_v4  ;;  %v3404_v4 = vld [vmem:[%s5428_s5 + $0x208] sm:$0xf0] }
 0x14a   : > { %1895 = vmatpush.bf16.msra.mxu2 %v3547_v5  ;;  %v4480_v5 = vld [vmem:[%s5428_s5 + $0x374] sm:$0xf] }
 0x14b   : > { %1909 = vmatpush.bf16.msra.mxu3 %v3739_v8  ;;  %1868 = vmatmul.bf16.vlgmr.msra.gmra.mxu0 %v5560_v27  ;;  %v3788_v8 = vld [vmem:[%s5428_s5 + $0x508] sm:$0xf0]  ;;  %v3599_v13 = vor.u32 %v4480_v5, %v3596_v6 }
 0x14c   : > { %1916 = vmatpush.bf16.msrb.mxu0 %v3335_v10  ;;  %1882 = vmatmul.bf16.vlgmr.msra.gmra.mxu1 %v5567_v34  ;;  %v3215_v10 = vor.u32 %v4384_v0, %v3212_v1  ;;  %v3791_v19 = vor.u32 %v4528_v7, %v3788_v8  ;;  %v449_v1 = vld [vmem:[#allocation2] sm:$0xff]  ;;  %v455_v7 = vld [vmem:[#allocation2 + $0x38] sm:$0xff] }
 0x14d   : > { %1930 = vmatpush.bf16.msrb.mxu1 %v3527_v11  ;;  %1896 = vmatmul.bf16.vlgmr.msra.gmra.mxu2 %v5542_v9  ;;  %v1645_v11 = vpop.f32.mrf.mxu0  ;;  %v1659_v18 = vpop.f32.mrf.mxu1 }
 0x14e   : > { %1944 = vmatpush.bf16.msrb.mxu2 %v3719_v12  ;;  %1910 = vmatmul.bf16.vlgmr.msra.gmra.mxu3 %v5549_v16  ;;  %v3407_v12 = vor.u32 %v4432_v2, %v3404_v4 }
 0x14f   : > { %1958 = vmatpush.bf16.msrb.mxu3 %v3911_v17  ;;  %v4426_v17 = vld [vmem:[%s5428_s5 + $0x1c4] sm:$0xf] }
 0x150   : > { %1917 = vmatpush.bf16.msrb.mxu0 %v3311_v23  ;;  %v1660_v23 = vadd.f32 %v1659_v18, %v1645_v11  ;;  %v3383_v32 = vor.u32 %v4426_v17, %v3380_v20  ;;  %v450_v17 = vld [vmem:[#allocation2 + $0x58] sm:$0xff] }
 0x151   : > { %1931 = vmatpush.bf16.msrb.mxu1 %v3503_v24  ;;  %v1673_v24 = vpop.f32.mrf.mxu2  ;;  %v1687_v28 = vpop.f32.mrf.mxu3 }
 0x152   : > { %1945 = vmatpush.bf16.msrb.mxu2 %v3695_v25  ;;  %v4522_v25 = vld [vmem:[%s5428_s5 + $0x4c4] sm:$0xf]  ;;  %v1674_v31 = vadd.f32 %v1673_v24, %v1660_v23 }
 0x153   : > { %1959 = vmatpush.bf16.msrb.mxu3 %v3887_v30  ;;  %v4372_v30 = vld [vmem:[%s5428_s5 + $0x14] sm:$0xf] }
 0x154   : > { %1918 = vmatpush.bf16.msrb.mxu0 %v3287_v37  ;;  %v448_v37 = vld [vmem:[#allocation2 + $0x30] sm:$0xff]  ;;  %v1688_v42 = vadd.f32 %v1687_v28, %v1674_v31  ;;  %v3167_v45 = vor.u32 %v4372_v30, %v3164_v35 }
 0x155   : > { %1932 = vmatpush.bf16.msrb.mxu1 %v3479_v38  ;;  %v3767_v38 = vor.u32 %v4522_v25, %v3764_v26  ;;  %v1647_v47 = vpop.f32.mrf.mxu0  ;;  %v456_v26 = vld [vmem:[#allocation2 + $0x28] sm:$0xff] }
 0x156   : > { %1946 = vmatpush.bf16.msrb.mxu2 %v3671_v39  ;;  %v3356_v39 = vld [vmem:[%s5428_s5 + $0x1a8] sm:$0xf0]  ;;  %v1972_v46 = vadd.f32 %v1688_v42, %v448_v37  ;;  %v451_v37 = vld [vmem:[#allocation2 + $0x18] sm:$0xff] }
 0x157   : > { %1960 = vmatpush.bf16.msrb.mxu3 %v3863_v43  ;;  %v4516_v43 = vld [vmem:[%s5428_s5 + $0x494] sm:$0xf]  ;;  %v3359_v48 = vor.u32 %v4420_v36, %v3356_v39 }
 0x158   : > { %1919 = vmatpush.bf16.msrb.mxu0 %v3263_v49  ;;  %v3551_v49 = vor.u32 %v4468_v40, %v3548_v41  ;;  %1984 = vst [vmem:[#allocation2 + $0x30] sm:$0xff] %v1972_v46  ;;  %v457_v46 = vld [vmem:[#allocation2 + $0x48] sm:$0xff] }
 0x159   : > { %1933 = vmatpush.bf16.msrb.mxu1 %v3455_v50  ;;  %v1661_v50 = vpop.f32.mrf.mxu1  ;;  %v1675_v53 = vpop.f32.mrf.mxu2 }
 0x15a   : > { %1947 = vmatpush.bf16.msrb.mxu2 %v3647_v51  ;;  %v3743_v51 = vor.u32 %v4516_v43, %v3740_v44  ;;  %v1662_v52 = vadd.f32 %v1661_v50, %v1647_v47  ;;  %v1689_v54 = vpop.f32.mrf.mxu3 }
 0x15b   : > { %1961 = vmatpush.bf16.msrb.mxu3 %v3839_v55 }
 0x15c   : > { %1920 = vmatpush.bf16.msrb.mxu0 %v3239_v61  ;;  %v1676_v55 = vadd.f32 %v1675_v53, %v1662_v52 }
 0x15d   : > { %1934 = vmatpush.bf16.msrb.mxu1 %v3431_v62 }
 0x15e   : > { %1948 = vmatpush.bf16.msrb.mxu2 %v3623_v63  ;;  %v1690_v57 = vadd.f32 %v1689_v54, %v1676_v55  ;;  %v452_v55 = vld [vmem:[#allocation2 + $0x50] sm:$0xff] }
 0x15f   : > { %1962 = vmatpush.bf16.msrb.mxu3 %v3815_v3 }
 0x160   : > { %1921 = vmatpush.bf16.msrb.mxu0 %v3215_v10  ;;  %v1978_v58 = vadd.f32 %v1690_v57, %v454_v56 }
 0x161   : > { %1935 = vmatpush.bf16.msrb.mxu1 %v3407_v12 }
 0x162   : > { %1949 = vmatpush.bf16.msrb.mxu2 %v3599_v13  ;;  %1990 = vst [vmem:[#allocation2 + $0x8] sm:$0xff] %v1978_v58 }
 0x163   : > { %1963 = vmatpush.bf16.msrb.mxu3 %v3791_v19 }
 0x164   : > { %1922 = vmatpush.bf16.msrb.mxu0 %v3191_v29 }
 0x165   : > { %1936 = vmatpush.bf16.msrb.mxu1 %v3383_v32 }
 0x166   : > { %1950 = vmatpush.bf16.msrb.mxu2 %v3575_v33 }
 0x167   : > { %1964 = vmatpush.bf16.msrb.mxu3 %v3767_v38 }
 0x168   : > { %1923 = vmatpush.bf16.msrb.mxu0 %v3167_v45  ;;  %v1701_v59 = vpop.f32.mrf.mxu0 }
 0x169   : > { %1937 = vmatpush.bf16.msrb.mxu1 %v3359_v48  ;;  %v1715_v60 = vpop.f32.mrf.mxu1 }
 0x16a   : > { %1951 = vmatpush.bf16.msrb.mxu2 %v3551_v49  ;;  %v1716_v61 = vadd.f32 %v1715_v60, %v1701_v59 }
 0x16b   : > { %1965 = vmatpush.bf16.msrb.mxu3 %v3743_v51  ;;  %1924 = vmatmul.bf16.vlgmr.msrb.gmra.mxu0 %v5560_v27 }
 0x16c   : > { %1938 = vmatmul.bf16.vlgmr.msrb.gmra.mxu1 %v5567_v34 }
 0x16d   : > { %1952 = vmatmul.bf16.vlgmr.msrb.gmra.mxu2 %v5542_v9 }
 0x16e   : > { %1966 = vmatmul.bf16.vlgmr.msrb.gmra.mxu3 %v5549_v16 }
 0x170   : > { %v1729_v62 = vpop.f32.mrf.mxu2  ;;  %v1703_v3 = vpop.f32.mrf.mxu0 }
 0x171   : > { %v1730_v63 = vadd.f32 %v1729_v62, %v1716_v61  ;;  %v1743_v0 = vpop.f32.mrf.mxu3  ;;  %v1717_v4 = vpop.f32.mrf.mxu1 }
 0x172   : > { %v1718_v27 = vadd.f32 %v1717_v4, %v1703_v3 }
 0x173   : > { %v1744_v2 = vadd.f32 %v1743_v0, %v1730_v63  ;;  %v458_v0 = vld [vmem:[#allocation2 + $0x10] sm:$0xff] }
 0x175   : > { %v1973_v5 = vadd.f32 %v1744_v2, %v449_v1 }
 0x177   : > { %1985 = vst [vmem:[#allocation2] sm:$0xff] %v1973_v5 }
 0x178   : > { %v1731_v34 = vpop.f32.mrf.mxu2 }
 0x179   : > { %v1732_v6 = vadd.f32 %v1731_v34, %v1718_v27  ;;  %v1745_v9 = vpop.f32.mrf.mxu3 }
 0x17b   : > { %v1746_v8 = vadd.f32 %v1745_v9, %v1732_v6  ;;  %v453_v9 = vld [vmem:[#allocation2 + $0x20] sm:$0xff] }
 0x17d   : > { %v1979_v16 = vadd.f32 %v1746_v8, %v455_v7 }
 0x17f   : > { %1991 = vst [vmem:[#allocation2 + $0x38] sm:$0xff] %v1979_v16 }
 0x188   : > { %v1757_v10 = vpop.f32.mrf.mxu0 }
 0x189   : > { %v1771_v11 = vpop.f32.mrf.mxu1 }
 0x18a   : > { %v1772_v12 = vadd.f32 %v1771_v11, %v1757_v10 }
 0x190   : > { %v1785_v13 = vpop.f32.mrf.mxu2  ;;  %v1759_v19 = vpop.f32.mrf.mxu0 }
 0x191   : > { %v1786_v14 = vadd.f32 %v1785_v13, %v1772_v12  ;;  %v1799_v15 = vpop.f32.mrf.mxu3  ;;  %v1773_v20 = vpop.f32.mrf.mxu1 }
 0x192   : > { %v1774_v22 = vadd.f32 %v1773_v20, %v1759_v19 }
 0x193   : > { %v1800_v18 = vadd.f32 %v1799_v15, %v1786_v14  ;;  %v459_v14 = vld [vmem:[#allocation2 + $0x40] sm:$0xff] }
 0x195   : > { %v1974_v21 = vadd.f32 %v1800_v18, %v450_v17 }
 0x197   : > { %1986 = vst [vmem:[#allocation2 + $0x58] sm:$0xff] %v1974_v21 }
 0x198   : > { %v1787_v23 = vpop.f32.mrf.mxu2 }
 0x199   : > { %v1788_v24 = vadd.f32 %v1787_v23, %v1774_v22  ;;  %v1801_v25 = vpop.f32.mrf.mxu3 }
 0x19b   : > { %v1802_v28 = vadd.f32 %v1801_v25, %v1788_v24 }
 0x19d   : > { %v1980_v29 = vadd.f32 %v1802_v28, %v456_v26 }
 0x19f   : > { %1992 = vst [vmem:[#allocation2 + $0x28] sm:$0xff] %v1980_v29 }
 0x1a8   : > { %v1813_v30 = vpop.f32.mrf.mxu0 }
 0x1a9   : > { %v1827_v31 = vpop.f32.mrf.mxu1 }
 0x1aa   : > { %v1828_v32 = vadd.f32 %v1827_v31, %v1813_v30 }
 0x1b0   : > { %v1841_v33 = vpop.f32.mrf.mxu2  ;;  %v1815_v39 = vpop.f32.mrf.mxu0 }
 0x1b1   : > { %v1842_v35 = vadd.f32 %v1841_v33, %v1828_v32  ;;  %v1855_v36 = vpop.f32.mrf.mxu3  ;;  %v1829_v40 = vpop.f32.mrf.mxu1 }
 0x1b2   : > { %v1830_v42 = vadd.f32 %v1829_v40, %v1815_v39 }
 0x1b3   : > { %v1856_v38 = vadd.f32 %v1855_v36, %v1842_v35 }
 0x1b5   : > { %v1975_v41 = vadd.f32 %v1856_v38, %v451_v37 }
 0x1b7   : > { %1987 = vst [vmem:[#allocation2 + $0x18] sm:$0xff] %v1975_v41 }
 0x1b8   : > { %v1843_v43 = vpop.f32.mrf.mxu2 }
 0x1b9   : > { %v1844_v44 = vadd.f32 %v1843_v43, %v1830_v42  ;;  %v1857_v45 = vpop.f32.mrf.mxu3 }
 0x1bb   : > { %v1858_v47 = vadd.f32 %v1857_v45, %v1844_v44 }
 0x1bd   : > { %v1981_v48 = vadd.f32 %v1858_v47, %v457_v46 }
 0x1bf   : > { %1993 = vst [vmem:[#allocation2 + $0x48] sm:$0xff] %v1981_v48 }
 0x1c8   : > { %v1869_v49 = vpop.f32.mrf.mxu0 }
 0x1c9   : > { %v1883_v50 = vpop.f32.mrf.mxu1 }
 0x1ca   : > { %v1884_v51 = vadd.f32 %v1883_v50, %v1869_v49 }
 0x1d0   : > { %v1897_v52 = vpop.f32.mrf.mxu2  ;;  %v1871_v57 = vpop.f32.mrf.mxu0 }
 0x1d1   : > { %v1898_v53 = vadd.f32 %v1897_v52, %v1884_v51  ;;  %v1911_v54 = vpop.f32.mrf.mxu3  ;;  %v1885_v58 = vpop.f32.mrf.mxu1 }
 0x1d2   : > { %v1886_v60 = vadd.f32 %v1885_v58, %v1871_v57 }
 0x1d3   : > { %v1912_v56 = vadd.f32 %v1911_v54, %v1898_v53 }
 0x1d5   : > { %v1976_v59 = vadd.f32 %v1912_v56, %v452_v55 }
 0x1d7   : > { %1988 = vst [vmem:[#allocation2 + $0x50] sm:$0xff] %v1976_v59 }
 0x1d8   : > { %v1899_v61 = vpop.f32.mrf.mxu2 }
 0x1d9   : > { %v1900_v62 = vadd.f32 %v1899_v61, %v1886_v60  ;;  %v1913_v63 = vpop.f32.mrf.mxu3 }
 0x1db   : > { %v1914_v1 = vadd.f32 %v1913_v63, %v1900_v62 }
 0x1dd   : > { %v1982_v2 = vadd.f32 %v1914_v1, %v458_v0 }
 0x1df   : > { %1994 = vst [vmem:[#allocation2 + $0x10] sm:$0xff] %v1982_v2 }
 0x1e8   : > { %v1925_v3 = vpop.f32.mrf.mxu0 }
 0x1e9   : > { %v1939_v4 = vpop.f32.mrf.mxu1 }
 0x1ea   : > { %v1940_v5 = vadd.f32 %v1939_v4, %v1925_v3 }
 0x1f0   : > { %v1953_v27 = vpop.f32.mrf.mxu2  ;;  %v1927_v8 = vpop.f32.mrf.mxu0 }
 0x1f1   : > { %v1954_v34 = vadd.f32 %v1953_v27, %v1940_v5  ;;  %v1967_v6 = vpop.f32.mrf.mxu3  ;;  %v1941_v16 = vpop.f32.mrf.mxu1 }
 0x1f2   : > { %v1942_v11 = vadd.f32 %v1941_v16, %v1927_v8 }
 0x1f3   : > { %v1968_v7 = vadd.f32 %v1967_v6, %v1954_v34 }
 0x1f5   : > { %v1977_v10 = vadd.f32 %v1968_v7, %v453_v9 }
 0x1f7   : > { %1989 = vst [vmem:[#allocation2 + $0x20] sm:$0xff] %v1977_v10 }
 0x1f8   : > { %v1955_v12 = vpop.f32.mrf.mxu2 }
 0x1f9   : > { %v1956_v13 = vadd.f32 %v1955_v12, %v1942_v11  ;;  %v1969_v15 = vpop.f32.mrf.mxu3 }
 0x1fb   : > { %v1970_v17 = vadd.f32 %v1969_v15, %v1956_v13 }
 0x1fd   : > { %v1983_v18 = vadd.f32 %v1970_v17, %v459_v14 }
 0x1ff   : > { %1995 = vst [vmem:[#allocation2 + $0x40] sm:$0xff] %v1983_v18 }
 0x200 PF: > { %p3912_p2 = scmp.ne.s32.totalorder %s5271_s23, 3 }
 0x202   : > { %1999 = sbr.rel (%p3912_p2) target bundleno = 904 (0x388), region = 88 }
 0x207   : > { %v3971_v19 = vld [vmem:[#allocation12 + $0x70] sm:$0xf]  ;;  %v4577_v20 = vld [vmem:[#allocation12 + $0x74] sm:$0xf0]  ;;  %v3963_v31 = vld [vmem:[#allocation12 + $0x60] sm:$0xf] }
 0x208   : > { %v4035_v21 = vld [vmem:[#allocation12 + $0xf0] sm:$0xf]  ;;  %v3972_v22 = vor.u32 %v4577_v20, %v3971_v19  ;;  %v4593_v23 = vld [vmem:[#allocation12 + $0xf4] sm:$0xf0]  ;;  %v4575_v33 = vld [vmem:[#allocation12 + $0x64] sm:$0xf0] }
 0x209   : > { %v4099_v24 = vld [vmem:[#allocation12 + $0x170] sm:$0xf]  ;;  %v4609_v25 = vld [vmem:[#allocation12 + $0x174] sm:$0xf0]  ;;  %v4036_v26 = vor.u32 %v4593_v23, %v4035_v21  ;;  %v4027_v35 = vld [vmem:[#allocation12 + $0xe0] sm:$0xf]  ;;  %v3964_v37 = vor.u32 %v4575_v33, %v3963_v31 }
 0x20a   : > { %v4100_v28 = vor.u32 %v4609_v25, %v4099_v24  ;;  %v4163_v29 = vld [vmem:[#allocation12 + $0x1f0] sm:$0xf]  ;;  %v4625_v30 = vld [vmem:[#allocation12 + $0x1f4] sm:$0xf0]  ;;  %2638 = vmatpush.bf16.msra.mxu0 %v3972_v22  ;;  %v4591_v36 = vld [vmem:[#allocation12 + $0xe4] sm:$0xf0] }
 0x20b   : > { %v4164_v32 = vor.u32 %v4625_v30, %v4163_v29  ;;  %2652 = vmatpush.bf16.msra.mxu1 %v4036_v26  ;;  %v4028_v38 = vor.u32 %v4591_v36, %v4027_v35  ;;  %v4091_v39 = vld [vmem:[#allocation12 + $0x160] sm:$0xf]  ;;  %v4607_v40 = vld [vmem:[#allocation12 + $0x164] sm:$0xf0]  ;;  %v3955_v44 = vld [vmem:[#allocation12 + $0x50] sm:$0xf] }
 0x20c   : > { %2666 = vmatpush.bf16.msra.mxu2 %v4100_v28  ;;  %v4155_v41 = vld [vmem:[#allocation12 + $0x1e0] sm:$0xf]  ;;  %v4092_v42 = vor.u32 %v4607_v40, %v4091_v39  ;;  %v4623_v43 = vld [vmem:[#allocation12 + $0x1e4] sm:$0xf0]  ;;  %v4573_v45 = vld [vmem:[#allocation12 + $0x54] sm:$0xf0] }
 0x20d   : > { %2680 = vmatpush.bf16.msra.mxu3 %v4164_v32  ;;  %v4156_v46 = vor.u32 %v4623_v43, %v4155_v41  ;;  %v4019_v47 = vld [vmem:[#allocation12 + $0xd0] sm:$0xf]  ;;  %v4589_v48 = vld [vmem:[#allocation12 + $0xd4] sm:$0xf0]  ;;  %v3956_v50 = vor.u32 %v4573_v45, %v3955_v44  ;;  %v3947_v56 = vld [vmem:[#allocation12 + $0x40] sm:$0xf] }
 0x20e   : > { %v4083_v49 = vld [vmem:[#allocation12 + $0x150] sm:$0xf]  ;;  %2639 = vmatpush.bf16.msra.mxu0 %v3964_v37  ;;  %v4605_v51 = vld [vmem:[#allocation12 + $0x154] sm:$0xf0]  ;;  %v4020_v54 = vor.u32 %v4589_v48, %v4019_v47  ;;  %v4571_v57 = vld [vmem:[#allocation12 + $0x44] sm:$0xf0] }
 0x20f   : > { %v4147_v52 = vld [vmem:[#allocation12 + $0x1d0] sm:$0xf]  ;;  %v4621_v53 = vld [vmem:[#allocation12 + $0x1d4] sm:$0xf0]  ;;  %2653 = vmatpush.bf16.msra.mxu1 %v4028_v38  ;;  %v4084_v55 = vor.u32 %v4605_v51, %v4083_v49  ;;  %v4011_v58 = vld [vmem:[#allocation12 + $0xc0] sm:$0xf]  ;;  %v3948_v1 = vor.u32 %v4571_v57, %v3947_v56 }
 0x210   : > { %2667 = vmatpush.bf16.msra.mxu2 %v4092_v42  ;;  %v4148_v59 = vor.u32 %v4621_v53, %v4147_v52  ;;  %v4587_v60 = vld [vmem:[#allocation12 + $0xc4] sm:$0xf0]  ;;  %v4075_v61 = vld [vmem:[#allocation12 + $0x140] sm:$0xf]  ;;  %v3939_v4 = vld [vmem:[#allocation12 + $0x30] sm:$0xf] }
 0x211   : > { %2681 = vmatpush.bf16.msra.mxu3 %v4156_v46  ;;  %v4603_v62 = vld [vmem:[#allocation12 + $0x144] sm:$0xf0]  ;;  %v4139_v63 = vld [vmem:[#allocation12 + $0x1c0] sm:$0xf]  ;;  %v4012_v2 = vor.u32 %v4587_v60, %v4011_v58  ;;  %v4569_v5 = vld [vmem:[#allocation12 + $0x34] sm:$0xf0] }
 0x212   : > { %v4619_v0 = vld [vmem:[#allocation12 + $0x1c4] sm:$0xf0]  ;;  %2640 = vmatpush.bf16.msra.mxu0 %v3956_v50  ;;  %v4076_v3 = vor.u32 %v4603_v62, %v4075_v61  ;;  %v4003_v27 = vld [vmem:[#allocation12 + $0xb0] sm:$0xf]  ;;  %v4585_v6 = vld [vmem:[#allocation12 + $0xb4] sm:$0xf0]  ;;  %v3940_v10 = vor.u32 %v4569_v5, %v3939_v4 }
 0x213   : > { %2654 = vmatpush.bf16.msra.mxu1 %v4020_v54  ;;  %v4140_v34 = vor.u32 %v4619_v0, %v4139_v63  ;;  %v4067_v9 = vld [vmem:[#allocation12 + $0x130] sm:$0xf]  ;;  %v4601_v7 = vld [vmem:[#allocation12 + $0x134] sm:$0xf0]  ;;  %v4004_v11 = vor.u32 %v4585_v6, %v4003_v27  ;;  %v3931_v13 = vld [vmem:[#allocation12 + $0x20] sm:$0xf] }
 0x214   : > { %2668 = vmatpush.bf16.msra.mxu2 %v4084_v55  ;;  %v4131_v8 = vld [vmem:[#allocation12 + $0x1b0] sm:$0xf]  ;;  %v4617_v16 = vld [vmem:[#allocation12 + $0x1b4] sm:$0xf0]  ;;  %v4068_v12 = vor.u32 %v4601_v7, %v4067_v9  ;;  %v4567_v14 = vld [vmem:[#allocation12 + $0x24] sm:$0xf0] }
 0x215   : > { %2682 = vmatpush.bf16.msra.mxu3 %v4148_v59  ;;  %v3995_v15 = vld [vmem:[#allocation12 + $0xa0] sm:$0xf]  ;;  %v4132_v17 = vor.u32 %v4617_v16, %v4131_v8  ;;  %v4583_v18 = vld [vmem:[#allocation12 + $0xa4] sm:$0xf0]  ;;  %v3932_v23 = vor.u32 %v4567_v14, %v3931_v13  ;;  %v3923_v26 = vld [vmem:[#allocation12 + $0x10] sm:$0xf] }
 0x216   : > { %2641 = vmatpush.bf16.msra.mxu0 %v3948_v1  ;;  %v4059_v19 = vld [vmem:[#allocation12 + $0x120] sm:$0xf]  ;;  %v4599_v20 = vld [vmem:[#allocation12 + $0x124] sm:$0xf0]  ;;  %v3996_v24 = vor.u32 %v4583_v18, %v3995_v15  ;;  %v4565_v28 = vld [vmem:[#allocation12 + $0x14] sm:$0xf0] }
 0x217   : > { %2655 = vmatpush.bf16.msra.mxu1 %v4012_v2  ;;  %v4123_v21 = vld [vmem:[#allocation12 + $0x1a0] sm:$0xf]  ;;  %v4615_v22 = vld [vmem:[#allocation12 + $0x1a4] sm:$0xf0]  ;;  %v4060_v25 = vor.u32 %v4599_v20, %v4059_v19  ;;  %v3987_v29 = vld [vmem:[#allocation12 + $0x90] sm:$0xf]  ;;  %v3924_v37 = vor.u32 %v4565_v28, %v3923_v26 }
 0x218   : > { %2669 = vmatpush.bf16.msra.mxu2 %v4076_v3  ;;  %v4124_v30 = vor.u32 %v4615_v22, %v4123_v21  ;;  %v4581_v31 = vld [vmem:[#allocation12 + $0x94] sm:$0xf0]  ;;  %v4051_v32 = vld [vmem:[#allocation12 + $0x110] sm:$0xf]  ;;  %v3915_v38 = vld [vmem:[#allocation12] sm:$0xf] }
 0x219   : > { %2683 = vmatpush.bf16.msra.mxu3 %v4140_v34  ;;  %v4597_v33 = vld [vmem:[#allocation12 + $0x114] sm:$0xf0]  ;;  %v4115_v35 = vld [vmem:[#allocation12 + $0x190] sm:$0xf]  ;;  %v4563_v39 = vld [vmem:[#allocation12 + $0x4] sm:$0xf0]  ;;  %v3988_v40 = vor.u32 %v4581_v31, %v3987_v29 }
 0x21a   : > { %2642 = vmatpush.bf16.msra.mxu0 %v3940_v10  ;;  %v4613_v36 = vld [vmem:[#allocation12 + $0x194] sm:$0xf0]  ;;  %v4052_v41 = vor.u32 %v4597_v33, %v4051_v32  ;;  %v3979_v42 = vld [vmem:[#allocation12 + $0x80] sm:$0xf]  ;;  %v4579_v43 = vld [vmem:[#allocation12 + $0x84] sm:$0xf0]  ;;  %v3916_v52 = vor.u32 %v4563_v39, %v3915_v38 }
 0x21b   : > { %2656 = vmatpush.bf16.msra.mxu1 %v4004_v11  ;;  %v4043_v44 = vld [vmem:[#allocation12 + $0x100] sm:$0xf]  ;;  %v4116_v45 = vor.u32 %v4613_v36, %v4115_v35  ;;  %v4595_v46 = vld [vmem:[#allocation12 + $0x104] sm:$0xf0]  ;;  %v4227_v49 = vld [vmem:[#allocation12 + $0x270] sm:$0xf]  ;;  %v3980_v56 = vor.u32 %v4579_v43, %v3979_v42 }
 0x21c   : > { %2670 = vmatpush.bf16.msra.mxu2 %v4068_v12  ;;  %v4107_v47 = vld [vmem:[#allocation12 + $0x180] sm:$0xf]  ;;  %v4611_v48 = vld [vmem:[#allocation12 + $0x184] sm:$0xf0]  ;;  %v4641_v50 = vld [vmem:[#allocation12 + $0x274] sm:$0xf0]  ;;  %v4044_v57 = vor.u32 %v4595_v46, %v4043_v44 }
 0x21d   : > { %2684 = vmatpush.bf16.msra.mxu3 %v4132_v17  ;;  %v4291_v51 = vld [vmem:[#allocation12 + $0x2f0] sm:$0xf]  ;;  %v4657_v53 = vld [vmem:[#allocation12 + $0x2f4] sm:$0xf0]  ;;  %v4576_v54 = vld [vmem:[#allocation12 + $0x74] sm:$0xf]  ;;  %v4108_v60 = vor.u32 %v4611_v48, %v4107_v47  ;;  %v4228_v61 = vor.u32 %v4641_v50, %v4227_v49 }
 0x21e   : > { %2643 = vmatpush.bf16.msra.mxu0 %v3932_v23  ;;  %v3973_v55 = vld [vmem:[#allocation12 + $0x78] sm:$0xf0]  ;;  %v4592_v58 = vld [vmem:[#allocation12 + $0xf4] sm:$0xf]  ;;  %v4219_v62 = vld [vmem:[#allocation12 + $0x260] sm:$0xf]  ;;  %v4292_v1 = vor.u32 %v4657_v53, %v4291_v51 }
 0x21f   : > { %2657 = vmatpush.bf16.msra.mxu1 %v3996_v24  ;;  %v4037_v59 = vld [vmem:[#allocation12 + $0xf8] sm:$0xf0]  ;;  %v4639_v63 = vld [vmem:[#allocation12 + $0x264] sm:$0xf0]  ;;  %v4283_v0 = vld [vmem:[#allocation12 + $0x2e0] sm:$0xf]  ;;  %v3976_v2 = vor.u32 %v4576_v54, %v3973_v55 }
 0x220   : > { %2671 = vmatpush.bf16.msra.mxu2 %v4060_v25  ;;  %v4655_v3 = vld [vmem:[#allocation12 + $0x2e4] sm:$0xf0]  ;;  %v4574_v4 = vld [vmem:[#allocation12 + $0x64] sm:$0xf]  ;;  %v3965_v5 = vld [vmem:[#allocation12 + $0x68] sm:$0xf0]  ;;  %v4040_v27 = vor.u32 %v4592_v58, %v4037_v59  ;;  %v4220_v10 = vor.u32 %v4639_v63, %v4219_v62 }
 0x221   : > { %2685 = vmatpush.bf16.msra.mxu3 %v4124_v30  ;;  %v4590_v34 = vld [vmem:[#allocation12 + $0xe4] sm:$0xf]  ;;  %v4029_v6 = vld [vmem:[#allocation12 + $0xe8] sm:$0xf0]  ;;  %v4211_v9 = vld [vmem:[#allocation12 + $0x250] sm:$0xf]  ;;  %v4284_v14 = vor.u32 %v4655_v3, %v4283_v0  ;;  %v3968_v15 = vor.u32 %v4574_v4, %v3965_v5 }
 0x222   : > { %2644 = vmatpush.bf16.msra.mxu0 %v3924_v37  ;;  %v2000_v7 = vld [vmem:[#allocation2 + $0x30] sm:$0xff]  ;;  %v2006_v8 = vld [vmem:[#allocation2 + $0x8] sm:$0xff]  ;;  %v5874_v16 = vld [vmem:[#allocation11] sm:$0x3f]  ;;  %v4032_v20 = vor.u32 %v4590_v34, %v4029_v6 }
 0x223   : > { %2658 = vmatpush.bf16.msra.mxu1 %v3988_v40  ;;  %v4637_v11 = vld [vmem:[#allocation12 + $0x254] sm:$0xf0]  ;;  %v4275_v12 = vld [vmem:[#allocation12 + $0x2d0] sm:$0xf]  ;;  %v2014_v13 = vperm.slane %v5874_v16, 0  ;;  %v2015_v29 = vperm.slane %v5874_v16, 1 }
 0x224   : > { %2672 = vmatpush.bf16.msra.mxu2 %v4052_v41  ;;  %v4653_v17 = vld [vmem:[#allocation12 + $0x2d4] sm:$0xf0]  ;;  %v4572_v18 = vld [vmem:[#allocation12 + $0x54] sm:$0xf]  ;;  %v3957_v19 = vld [vmem:[#allocation12 + $0x58] sm:$0xf0]  ;;  %v4212_v26 = vor.u32 %v4637_v11, %v4211_v9 }
 0x225   : > { %2686 = vmatpush.bf16.msra.mxu3 %v4116_v45  ;;  %v4588_v21 = vld [vmem:[#allocation12 + $0xd4] sm:$0xf]  ;;  %v4021_v22 = vld [vmem:[#allocation12 + $0xd8] sm:$0xf0]  ;;  %v2026_v23 = vadd.f32 %v2014_v13, %v2000_v7  ;;  %v2032_v24 = vadd.f32 %v2014_v13, %v2006_v8  ;;  %v2008_v31 = vld [vmem:[#allocation2 + $0x28] sm:$0xff]  ;;  %v2016_v32 = vperm.slane %v5874_v16, 2  ;;  %v4276_v33 = vor.u32 %v4653_v17, %v4275_v12 }
 0x226   : > { %2645 = vmatpush.bf16.msra.mxu0 %v3916_v52  ;;  %v2001_v25 = vld [vmem:[#allocation2] sm:$0xff]  ;;  %v2007_v28 = vld [vmem:[#allocation2 + $0x38] sm:$0xff]  ;;  %v3960_v35 = vor.u32 %v4572_v18, %v3957_v19  ;;  %v4635_v37 = vld [vmem:[#allocation12 + $0x244] sm:$0xf0]  ;;  %v4024_v46 = vor.u32 %v4588_v21, %v4021_v22 }
 0x227   : > { %2659 = vmatpush.bf16.msra.mxu1 %v3980_v56  ;;  %v2002_v30 = vld [vmem:[#allocation2 + $0x58] sm:$0xff]  ;;  %v4203_v36 = vld [vmem:[#allocation12 + $0x240] sm:$0xf]  ;;  %v2038_v38 = vmax.f32 %v2026_v23, 0.0  ;;  %v2044_v39 = vmax.f32 %v2032_v24, 0.0  ;;  %v2027_v43 = vadd.f32 %v2015_v29, %v2001_v25  ;;  %v2033_v44 = vadd.f32 %v2015_v29, %v2007_v28 }
 0x228   : > { %2673 = vmatpush.bf16.msra.mxu2 %v4044_v57  ;;  %v4267_v40 = vld [vmem:[#allocation12 + $0x2c0] sm:$0xf]  ;;  %v4651_v41 = vld [vmem:[#allocation12 + $0x2c4] sm:$0xf0]  ;;  %v4570_v42 = vld [vmem:[#allocation12 + $0x44] sm:$0xf]  ;;  %v2028_v45 = vadd.f32 %v2016_v32, %v2002_v30  ;;  %v2034_v51 = vadd.f32 %v2016_v32, %v2008_v31  ;;  %v4204_v57 = vor.u32 %v4635_v37, %v4203_v36 }
 0x229   : > { %2687 = vmatpush.bf16.msra.mxu3 %v4108_v60  ;;  %v3949_v47 = vld [vmem:[#allocation12 + $0x48] sm:$0xf0]  ;;  %v4586_v48 = vld [vmem:[#allocation12 + $0xc4] sm:$0xf]  ;;  %v5879_v50 = vpack.c.bf16 %v2044_v39, %v2038_v38  ;;  %v2039_v52 = vmax.f32 %v2027_v43, 0.0  ;;  %v2045_v53 = vmax.f32 %v2033_v44, 0.0  ;;  %v4268_v58 = vor.u32 %v4651_v41, %v4267_v40 }
 0x22a   : > { %2694 = vmatpush.bf16.msrb.mxu0 %v4228_v61  ;;  %v4013_v49 = vld [vmem:[#allocation12 + $0xc8] sm:$0xf0]  ;;  %v2040_v54 = vmax.f32 %v2028_v45, 0.0  ;;  %v2003_v55 = vld [vmem:[#allocation2 + $0x18] sm:$0xff]  ;;  %v2009_v56 = vld [vmem:[#allocation2 + $0x48] sm:$0xff]  ;;  %v2046_v59 = vmax.f32 %v2034_v51, 0.0  ;;  %v3952_v61 = vor.u32 %v4570_v42, %v3949_v47 }
 0x22b   : > { %2708 = vmatpush.bf16.msrb.mxu1 %v4292_v1  ;;  %v2017_v60 = vperm.slane %v5874_v16, 3  ;;  %v4016_v62 = vor.u32 %v4586_v48, %v4013_v49  ;;  %v4195_v63 = vld [vmem:[#allocation12 + $0x230] sm:$0xf]  ;;  %v4633_v0 = vld [vmem:[#allocation12 + $0x234] sm:$0xf0]  ;;  %2646 = vmatmul.bf16.vlgmr.msra.gmra.mxu0 %v5879_v50  ;;  %v2018_v31 = vperm.slane %v5874_v16, 4 }
 0x22c   : > { %2722 = vmatpush.bf16.msrb.mxu2 %v3976_v2  ;;  %v4259_v1 = vld [vmem:[#allocation12 + $0x2b0] sm:$0xf]  ;;  %v5882_v2 = vpack.c.bf16 %v2045_v53, %v2039_v52  ;;  %v4649_v3 = vld [vmem:[#allocation12 + $0x2b4] sm:$0xf0]  ;;  %v4568_v4 = vld [vmem:[#allocation12 + $0x34] sm:$0xf]  ;;  %v4196_v8 = vor.u32 %v4633_v0, %v4195_v63 }
 0x22d   : > { %2736 = vmatpush.bf16.msrb.mxu3 %v4040_v27  ;;  %v3941_v5 = vld [vmem:[#allocation12 + $0x38] sm:$0xf0]  ;;  %v5885_v27 = vpack.c.bf16 %v2046_v59, %v2040_v54  ;;  %v2029_v34 = vadd.f32 %v2017_v60, %v2003_v55  ;;  %v2035_v6 = vadd.f32 %v2017_v60, %v2009_v56  ;;  %v4584_v9 = vld [vmem:[#allocation12 + $0xb4] sm:$0xf]  ;;  %v4260_v12 = vor.u32 %v4649_v3, %v4259_v1  ;;  %v4251_v17 = vld [vmem:[#allocation12 + $0x2a0] sm:$0xf] }
 0x22e   : > { %2695 = vmatpush.bf16.msrb.mxu0 %v4220_v10  ;;  %v4005_v7 = vld [vmem:[#allocation12 + $0xb8] sm:$0xf0]  ;;  %2660 = vmatmul.bf16.vlgmr.msra.gmra.mxu1 %v5882_v2  ;;  %v3944_v13 = vor.u32 %v4568_v4, %v3941_v5  ;;  %v4647_v19 = vld [vmem:[#allocation12 + $0x2a4] sm:$0xf0]  ;;  %v3933_v21 = vld [vmem:[#allocation12 + $0x28] sm:$0xf0] }
 0x22f   : > { %2709 = vmatpush.bf16.msrb.mxu1 %v4284_v14  ;;  %2674 = vmatmul.bf16.vlgmr.msra.gmra.mxu2 %v5885_v27  ;;  %v2041_v10 = vmax.f32 %v2029_v34, 0.0  ;;  %v2047_v11 = vmax.f32 %v2035_v6, 0.0  ;;  %v4187_v14 = vld [vmem:[#allocation12 + $0x220] sm:$0xf]  ;;  %v4008_v18 = vor.u32 %v4584_v9, %v4005_v7  ;;  %v4582_v23 = vld [vmem:[#allocation12 + $0xa4] sm:$0xf]  ;;  %v4252_v32 = vor.u32 %v4647_v19, %v4251_v17 }
 0x230   : > { %2723 = vmatpush.bf16.msrb.mxu2 %v3968_v15  ;;  %v4631_v15 = vld [vmem:[#allocation12 + $0x224] sm:$0xf0]  ;;  %v3997_v24 = vld [vmem:[#allocation12 + $0xa8] sm:$0xf0]  ;;  %v4179_v25 = vld [vmem:[#allocation12 + $0x210] sm:$0xf] }
 0x231   : > { %2737 = vmatpush.bf16.msrb.mxu3 %v4032_v20  ;;  %v4566_v20 = vld [vmem:[#allocation12 + $0x24] sm:$0xf]  ;;  %v5889_v22 = vpack.c.bf16 %v2047_v11, %v2041_v10  ;;  %v4629_v28 = vld [vmem:[#allocation12 + $0x214] sm:$0xf0]  ;;  %v4243_v29 = vld [vmem:[#allocation12 + $0x290] sm:$0xf]  ;;  %v4000_v39 = vor.u32 %v4582_v23, %v3997_v24 }
 0x232   : > { %2696 = vmatpush.bf16.msrb.mxu0 %v4212_v26  ;;  %v4188_v26 = vor.u32 %v4631_v15, %v4187_v14  ;;  %v2004_v30 = vld [vmem:[#allocation2 + $0x50] sm:$0xff]  ;;  %v4564_v36 = vld [vmem:[#allocation12 + $0x14] sm:$0xf]  ;;  %v2019_v38 = vperm.slane %v5874_v16, 5  ;;  %v3925_v40 = vld [vmem:[#allocation12 + $0x18] sm:$0xf0]  ;;  %v4180_v45 = vor.u32 %v4629_v28, %v4179_v25 }
 0x233   : > { %2710 = vmatpush.bf16.msrb.mxu1 %v4276_v33  ;;  %2688 = vmatmul.bf16.vlgmr.msra.gmra.mxu3 %v5889_v22  ;;  %v3936_v33 = vor.u32 %v4566_v20, %v3933_v21  ;;  %v2010_v37 = vld [vmem:[#allocation2 + $0x10] sm:$0xff]  ;;  %v2005_v41 = vld [vmem:[#allocation2 + $0x20] sm:$0xff]  ;;  %v4580_v43 = vld [vmem:[#allocation12 + $0x94] sm:$0xf]  ;;  %v2030_v51 = vadd.f32 %v2018_v31, %v2004_v30  ;;  %v3928_v53 = vor.u32 %v4564_v36, %v3925_v40 }
 0x234   : > { %2724 = vmatpush.bf16.msrb.mxu2 %v3960_v35  ;;  %v4645_v35 = vld [vmem:[#allocation12 + $0x294] sm:$0xf0]  ;;  %v3989_v44 = vld [vmem:[#allocation12 + $0x98] sm:$0xf0]  ;;  %v4171_v47 = vld [vmem:[#allocation12 + $0x200] sm:$0xf]  ;;  %v2036_v52 = vadd.f32 %v2018_v31, %v2010_v37  ;;  %v2031_v56 = vadd.f32 %v2019_v38, %v2005_v41 }
 0x235   : > { %2738 = vmatpush.bf16.msrb.mxu3 %v4024_v46  ;;  %v2011_v42 = vld [vmem:[#allocation2 + $0x40] sm:$0xff]  ;;  %v4244_v46 = vor.u32 %v4645_v35, %v4243_v29  ;;  %v4627_v48 = vld [vmem:[#allocation12 + $0x204] sm:$0xf0]  ;;  %v4562_v16 = vld [vmem:[#allocation12 + $0x4] sm:$0xf]  ;;  %v2042_v5 = vmax.f32 %v2030_v51, 0.0 }
 0x236   : > { %2697 = vmatpush.bf16.msrb.mxu0 %v4204_v57  ;;  %v4235_v49 = vld [vmem:[#allocation12 + $0x280] sm:$0xf]  ;;  %v4643_v54 = vld [vmem:[#allocation12 + $0x284] sm:$0xf0]  ;;  %v3917_v55 = vld [vmem:[#allocation12 + $0x8] sm:$0xf0]  ;;  %v2037_v57 = vadd.f32 %v2019_v38, %v2011_v42  ;;  %v4172_v1 = vor.u32 %v4627_v48, %v4171_v47 }
 0x237   : > { %2711 = vmatpush.bf16.msrb.mxu1 %v4268_v58  ;;  %v3992_v58 = vor.u32 %v4580_v43, %v3989_v44  ;;  %v4578_v59 = vld [vmem:[#allocation12 + $0x84] sm:$0xf]  ;;  %v3981_v60 = vld [vmem:[#allocation12 + $0x88] sm:$0xf0]  ;;  %v4624_v63 = vld [vmem:[#allocation12 + $0x1f4] sm:$0xf]  ;;  %v4236_v6 = vor.u32 %v4643_v54, %v4235_v49  ;;  %v3920_v9 = vor.u32 %v4562_v16, %v3917_v55 }
 0x238   : > { %2725 = vmatpush.bf16.msrb.mxu2 %v3952_v61  ;;  %v4608_v61 = vld [vmem:[#allocation12 + $0x174] sm:$0xf]  ;;  %v4165_v0 = vld [vmem:[#allocation12 + $0x1f8] sm:$0xf0]  ;;  %v2048_v34 = vmax.f32 %v2036_v52, 0.0  ;;  %v2043_v10 = vmax.f32 %v2031_v56, 0.0 }
 0x239   : > { %2739 = vmatpush.bf16.msrb.mxu3 %v4016_v62  ;;  %v4101_v62 = vld [vmem:[#allocation12 + $0x178] sm:$0xf0]  ;;  %v4640_v3 = vld [vmem:[#allocation12 + $0x274] sm:$0xf]  ;;  %v2049_v11 = vmax.f32 %v2037_v57, 0.0  ;;  %v4168_v14 = vor.u32 %v4624_v63, %v4165_v0 }
 0x23a   : > { %2698 = vmatpush.bf16.msrb.mxu0 %v4196_v8  ;;  %v4229_v4 = vld [vmem:[#allocation12 + $0x278] sm:$0xf0]  ;;  %v4656_v7 = vld [vmem:[#allocation12 + $0x2f4] sm:$0xf]  ;;  %v4606_v17 = vld [vmem:[#allocation12 + $0x164] sm:$0xf]  ;;  %v5894_v21 = vpack.c.bf16 %v2048_v34, %v2042_v5 }
 0x23b   : > { %2712 = vmatpush.bf16.msrb.mxu1 %v4260_v12  ;;  %v4293_v8 = vld [vmem:[#allocation12 + $0x2f8] sm:$0xf0]  ;;  %v3984_v12 = vor.u32 %v4578_v59, %v3981_v60  ;;  %v4232_v15 = vor.u32 %v4640_v3, %v4229_v4  ;;  %v4622_v19 = vld [vmem:[#allocation12 + $0x1e4] sm:$0xf]  ;;  %v4157_v23 = vld [vmem:[#allocation12 + $0x1e8] sm:$0xf0] }
 0x23c   : > { %2726 = vmatpush.bf16.msrb.mxu2 %v3944_v13  ;;  %v4104_v13 = vor.u32 %v4608_v61, %v4101_v62  ;;  %v4296_v20 = vor.u32 %v4656_v7, %v4293_v8  ;;  %v4638_v24 = vld [vmem:[#allocation12 + $0x264] sm:$0xf]  ;;  %v4221_v25 = vld [vmem:[#allocation12 + $0x268] sm:$0xf0]  ;;  %v4160_v31 = vor.u32 %v4622_v19, %v4157_v23  ;;  %v4085_v35 = vld [vmem:[#allocation12 + $0x158] sm:$0xf0] }
 0x23d   : > { %2740 = vmatpush.bf16.msrb.mxu3 %v4008_v18  ;;  %v4093_v18 = vld [vmem:[#allocation12 + $0x168] sm:$0xf0]  ;;  %v4654_v28 = vld [vmem:[#allocation12 + $0x2e4] sm:$0xf]  ;;  %v4620_v36 = vld [vmem:[#allocation12 + $0x1d4] sm:$0xf] }
 0x23e   : > { %2699 = vmatpush.bf16.msrb.mxu0 %v4188_v26  ;;  %v5896_v26 = vpack.c.bf16 %v2049_v11, %v2043_v10  ;;  %v4285_v29 = vld [vmem:[#allocation12 + $0x2e8] sm:$0xf0]  ;;  %v4096_v30 = vor.u32 %v4606_v17, %v4093_v18  ;;  %v4149_v38 = vld [vmem:[#allocation12 + $0x1d8] sm:$0xf0]  ;;  %v4652_v41 = vld [vmem:[#allocation12 + $0x2d4] sm:$0xf] }
 0x23f   : > { %2713 = vmatpush.bf16.msrb.mxu1 %v4252_v32  ;;  %v4224_v32 = vor.u32 %v4638_v24, %v4221_v25  ;;  %v4288_v37 = vor.u32 %v4654_v28, %v4285_v29  ;;  %v4213_v40 = vld [vmem:[#allocation12 + $0x258] sm:$0xf0]  ;;  %v4152_v44 = vor.u32 %v4620_v36, %v4149_v38  ;;  %v4077_v47 = vld [vmem:[#allocation12 + $0x148] sm:$0xf0]  ;;  %v4618_v48 = vld [vmem:[#allocation12 + $0x1c4] sm:$0xf] }
 0x240   : > { %2727 = vmatpush.bf16.msrb.mxu2 %v3936_v33  ;;  %v4604_v33 = vld [vmem:[#allocation12 + $0x154] sm:$0xf]  ;;  %v4277_v42 = vld [vmem:[#allocation12 + $0x2d8] sm:$0xf0]  ;;  %v4141_v51 = vld [vmem:[#allocation12 + $0x1c8] sm:$0xf0] }
 0x241   : > { %2741 = vmatpush.bf16.msrb.mxu3 %v4000_v39  ;;  %v4636_v39 = vld [vmem:[#allocation12 + $0x254] sm:$0xf]  ;;  %v4088_v43 = vor.u32 %v4604_v33, %v4085_v35  ;;  %v4280_v49 = vor.u32 %v4652_v41, %v4277_v42  ;;  %v4634_v52 = vld [vmem:[#allocation12 + $0x244] sm:$0xf]  ;;  %v4144_v55 = vor.u32 %v4618_v48, %v4141_v51  ;;  %v4069_v57 = vld [vmem:[#allocation12 + $0x138] sm:$0xf0] }
 0x242   : > { %2700 = vmatpush.bf16.msrb.mxu0 %v4180_v45  ;;  %v4216_v45 = vor.u32 %v4636_v39, %v4213_v40  ;;  %v4650_v54 = vld [vmem:[#allocation12 + $0x2c4] sm:$0xf]  ;;  %v4600_v56 = vld [vmem:[#allocation12 + $0x134] sm:$0xf]  ;;  %v4133_v60 = vld [vmem:[#allocation12 + $0x1b8] sm:$0xf0] }
 0x243   : > { %2714 = vmatpush.bf16.msrb.mxu1 %v4244_v46  ;;  %v4602_v46 = vld [vmem:[#allocation12 + $0x144] sm:$0xf]  ;;  %v4632_v61 = vld [vmem:[#allocation12 + $0x234] sm:$0xf]  ;;  %v4197_v62 = vld [vmem:[#allocation12 + $0x238] sm:$0xf0] }
 0x244   : > { %2728 = vmatpush.bf16.msrb.mxu2 %v3928_v53  ;;  %v4205_v53 = vld [vmem:[#allocation12 + $0x248] sm:$0xf0]  ;;  %v4080_v16 = vor.u32 %v4602_v46, %v4077_v47  ;;  %v4648_v63 = vld [vmem:[#allocation12 + $0x2b4] sm:$0xf]  ;;  %v4261_v0 = vld [vmem:[#allocation12 + $0x2b8] sm:$0xf0]  ;;  %v4200_v4 = vor.u32 %v4632_v61, %v4197_v62 }
 0x245   : > { %2742 = vmatpush.bf16.msrb.mxu3 %v3992_v58  ;;  %v4616_v58 = vld [vmem:[#allocation12 + $0x1b4] sm:$0xf]  ;;  %v4598_v5 = vld [vmem:[#allocation12 + $0x124] sm:$0xf]  ;;  %v4061_v34 = vld [vmem:[#allocation12 + $0x128] sm:$0xf0] }
 0x246   : > { %2701 = vmatpush.bf16.msrb.mxu0 %v4172_v1  ;;  %v4072_v1 = vor.u32 %v4600_v56, %v4069_v57  ;;  %v4136_v3 = vor.u32 %v4616_v58, %v4133_v60  ;;  %v4125_v7 = vld [vmem:[#allocation12 + $0x1a8] sm:$0xf0]  ;;  %v4630_v8 = vld [vmem:[#allocation12 + $0x224] sm:$0xf]  ;;  %v4596_v17 = vld [vmem:[#allocation12 + $0x114] sm:$0xf] }
 0x247   : > { %2715 = vmatpush.bf16.msrb.mxu1 %v4236_v6  ;;  %v4614_v6 = vld [vmem:[#allocation12 + $0x1a4] sm:$0xf]  ;;  %v4189_v10 = vld [vmem:[#allocation12 + $0x228] sm:$0xf0]  ;;  %v4053_v18 = vld [vmem:[#allocation12 + $0x118] sm:$0xf0] }
 0x248   : > { %2729 = vmatpush.bf16.msrb.mxu2 %v3920_v9  ;;  %v4264_v9 = vor.u32 %v4648_v63, %v4261_v0  ;;  %v4646_v11 = vld [vmem:[#allocation12 + $0x2a4] sm:$0xf]  ;;  %v4612_v19 = vld [vmem:[#allocation12 + $0x194] sm:$0xf]  ;;  %v4117_v23 = vld [vmem:[#allocation12 + $0x198] sm:$0xf0] }
 0x249   : > { %2743 = vmatpush.bf16.msrb.mxu3 %v3984_v12  ;;  %2702 = vmatmul.bf16.vlgmr.msrb.gmra.mxu0 %v5894_v21  ;;  %v4253_v12 = vld [vmem:[#allocation12 + $0x2a8] sm:$0xf0]  ;;  %v4628_v24 = vld [vmem:[#allocation12 + $0x214] sm:$0xf]  ;;  %v4181_v25 = vld [vmem:[#allocation12 + $0x218] sm:$0xf0] }
 0x24a   : > { %2750 = vmatpush.bf16.msra.mxu0 %v4104_v13  ;;  %2716 = vmatmul.bf16.vlgmr.msrb.gmra.mxu1 %v5896_v26  ;;  %v4064_v13 = vor.u32 %v4598_v5, %v4061_v34  ;;  %v4644_v28 = vld [vmem:[#allocation12 + $0x294] sm:$0xf]  ;;  %v4245_v29 = vld [vmem:[#allocation12 + $0x298] sm:$0xf0]  ;;  %v4594_v33 = vld [vmem:[#allocation12 + $0x104] sm:$0xf] }
 0x24b   : > { %2764 = vmatpush.bf16.msra.mxu1 %v4168_v14  ;;  %2730 = vmatmul.bf16.vlgmr.msrb.gmra.mxu2 %v5879_v50  ;;  %v4269_v50 = vld [vmem:[#allocation12 + $0x2c8] sm:$0xf0]  ;;  %v4128_v14 = vor.u32 %v4614_v6, %v4125_v7  ;;  %v4610_v36 = vld [vmem:[#allocation12 + $0x184] sm:$0xf]  ;;  %v4665_v47 = vld [vmem:[#allocation15 + $0x38] sm:$0xff] }
 0x24c   : > { %2778 = vmatpush.bf16.msra.mxu2 %v4232_v15  ;;  %2744 = vmatmul.bf16.vlgmr.msrb.gmra.mxu3 %v5882_v2  ;;  %v4208_v2 = vor.u32 %v4634_v52, %v4205_v53  ;;  %v4272_v59 = vor.u32 %v4650_v54, %v4269_v50  ;;  %v4192_v15 = vor.u32 %v4630_v8, %v4189_v10  ;;  %v4045_v35 = vld [vmem:[#allocation12 + $0x108] sm:$0xf0]  ;;  %v4626_v39 = vld [vmem:[#allocation12 + $0x204] sm:$0xf]  ;;  %v4664_v48 = vld [vmem:[#allocation15 + $0x30] sm:$0xff] }
 0x24d   : > { %2792 = vmatpush.bf16.msra.mxu3 %v4296_v20  ;;  %v4256_v20 = vor.u32 %v4646_v11, %v4253_v12  ;;  %v4109_v38 = vld [vmem:[#allocation12 + $0x188] sm:$0xf0]  ;;  %v4642_v41 = vld [vmem:[#allocation12 + $0x284] sm:$0xf]  ;;  %v4661_v52 = vld [vmem:[#allocation15 + $0x18] sm:$0xff] }
 0x24e   : > { %2751 = vmatpush.bf16.msra.mxu0 %v4096_v30  ;;  %v4056_v30 = vor.u32 %v4596_v17, %v4053_v18  ;;  %v4173_v40 = vld [vmem:[#allocation12 + $0x208] sm:$0xf0]  ;;  %v4662_v51 = vld [vmem:[#allocation15 + $0x20] sm:$0xff]  ;;  %v4660_v53 = vld [vmem:[#allocation15 + $0x10] sm:$0xff] }
 0x24f   : > { %2765 = vmatpush.bf16.msra.mxu1 %v4160_v31  ;;  %v4120_v31 = vor.u32 %v4612_v19, %v4117_v23  ;;  %v4237_v42 = vld [vmem:[#allocation12 + $0x288] sm:$0xf0]  ;;  %v4672_v56 = vld [vmem:[#allocation15 + $0x70] sm:$0xff]  ;;  %v4670_v5 = vld [vmem:[#allocation15 + $0x60] sm:$0xff] }
 0x250   : > { %2779 = vmatpush.bf16.msra.mxu2 %v4224_v32  ;;  %v4184_v32 = vor.u32 %v4628_v24, %v4181_v25  ;;  %v4240_v46 = vor.u32 %v4642_v41, %v4237_v42  ;;  %v4659_v54 = vld [vmem:[#allocation15 + $0x8] sm:$0xff]  ;;  %v4669_v10 = vld [vmem:[#allocation15 + $0x58] sm:$0xff]  ;;  %v4666_v24 = vld [vmem:[#allocation15 + $0x40] sm:$0xff] }
 0x251   : > { %2793 = vmatpush.bf16.msra.mxu3 %v4288_v37  ;;  %v4248_v37 = vor.u32 %v4644_v28, %v4245_v29  ;;  %v4671_v0 = vld [vmem:[#allocation15 + $0x68] sm:$0xff] }
 0x252   : > { %2752 = vmatpush.bf16.msra.mxu0 %v4088_v43  ;;  %v4048_v43 = vor.u32 %v4594_v33, %v4045_v35 }
 0x253   : > { %2766 = vmatpush.bf16.msra.mxu1 %v4152_v44  ;;  %v4112_v44 = vor.u32 %v4610_v36, %v4109_v38 }
 0x254   : > { %2780 = vmatpush.bf16.msra.mxu2 %v4216_v45  ;;  %v4176_v45 = vor.u32 %v4626_v39, %v4173_v40 }
 0x255   : > { %2794 = vmatpush.bf16.msra.mxu3 %v4280_v49  ;;  %v4663_v49 = vld [vmem:[#allocation15 + $0x28] sm:$0xff] }
 0x256   : > { %2753 = vmatpush.bf16.msra.mxu0 %v4080_v16 }
 0x257   : > { %2767 = vmatpush.bf16.msra.mxu1 %v4144_v55 }
 0x258   : > { %2781 = vmatpush.bf16.msra.mxu2 %v4208_v2 }
 0x259   : > { %2795 = vmatpush.bf16.msra.mxu3 %v4272_v59 }
 0x25a   : > { %2754 = vmatpush.bf16.msra.mxu0 %v4072_v1 }
 0x25b   : > { %2768 = vmatpush.bf16.msra.mxu1 %v4136_v3 }
 0x25c   : > { %2782 = vmatpush.bf16.msra.mxu2 %v4200_v4 }
 0x25d   : > { %2796 = vmatpush.bf16.msra.mxu3 %v4264_v9 }
 0x25e   : > { %2755 = vmatpush.bf16.msra.mxu0 %v4064_v13 }
 0x25f   : > { %2769 = vmatpush.bf16.msra.mxu1 %v4128_v14 }
 0x260   : > { %2783 = vmatpush.bf16.msra.mxu2 %v4192_v15  ;;  %v4668_v15 = vld [vmem:[#allocation15 + $0x50] sm:$0xff] }
 0x261   : > { %2797 = vmatpush.bf16.msra.mxu3 %v4256_v20  ;;  %v4667_v20 = vld [vmem:[#allocation15 + $0x48] sm:$0xff] }
 0x262   : > { %2756 = vmatpush.bf16.msra.mxu0 %v4056_v30 }
 0x263   : > { %2770 = vmatpush.bf16.msra.mxu1 %v4120_v31 }
 0x264   : > { %2784 = vmatpush.bf16.msra.mxu2 %v4184_v32 }
 0x265   : > { %2798 = vmatpush.bf16.msra.mxu3 %v4248_v37 }
 0x266   : > { %2757 = vmatpush.bf16.msra.mxu0 %v4048_v43 }
 0x267   : > { %2771 = vmatpush.bf16.msra.mxu1 %v4112_v44 }
 0x268   : > { %2785 = vmatpush.bf16.msra.mxu2 %v4176_v45 }
 0x269   : > { %2799 = vmatpush.bf16.msra.mxu3 %v4240_v46  ;;  %2758 = vmatmul.bf16.vlgmr.msra.gmra.mxu0 %v5885_v27  ;;  %v2152_v27 = vld [vmem:[#allocation14] sm:$0x3] }
 0x26a   : > { %2772 = vmatmul.bf16.vlgmr.msra.gmra.mxu1 %v5889_v22  ;;  %2944 = vmatpush.bf16.msrb.mxu0 %v4665_v47  ;;  %v2154_v16 = vperm.slane %v2152_v27, 0  ;;  %v2155_v29 = vperm.slane %v2152_v27, 1 }
 0x26b   : > { %2786 = vmatmul.bf16.vlgmr.msra.gmra.mxu2 %v5894_v21  ;;  %v4658_v21 = vld [vmem:[#allocation15] sm:$0xff] }
 0x26c   : > { %2800 = vmatmul.bf16.vlgmr.msra.gmra.mxu3 %v5896_v26  ;;  %v4673_v26 = vld [vmem:[#allocation15 + $0x78] sm:$0xff] }
 0x26d   : > { %2958 = vmatpush.bf16.msrb.mxu1 %v4673_v26 }
 0x26e   : > { %2945 = vmatpush.bf16.msrb.mxu0 %v4664_v48 }
 0x271   : > { %2959 = vmatpush.bf16.msrb.mxu1 %v4672_v56 }
 0x272   : > { %2946 = vmatpush.bf16.msrb.mxu0 %v4663_v49 }
 0x275   : > { %2960 = vmatpush.bf16.msrb.mxu1 %v4671_v0 }
 0x276   : > { %2947 = vmatpush.bf16.msrb.mxu0 %v4662_v51 }
 0x279   : > { %2961 = vmatpush.bf16.msrb.mxu1 %v4670_v5 }
 0x27a   : > { %2948 = vmatpush.bf16.msrb.mxu0 %v4661_v52 }
 0x27d   : > { %2962 = vmatpush.bf16.msrb.mxu1 %v4669_v10 }
 0x27e   : > { %2949 = vmatpush.bf16.msrb.mxu0 %v4660_v53 }
 0x281   : > { %2963 = vmatpush.bf16.msrb.mxu1 %v4668_v15 }
 0x282   : > { %2950 = vmatpush.bf16.msrb.mxu0 %v4659_v54 }
 0x285   : > { %2964 = vmatpush.bf16.msrb.mxu1 %v4667_v20 }
 0x286   : > { %2951 = vmatpush.bf16.msrb.mxu0 %v4658_v21  ;;  %v4824_v21 = vld [vmem:[#allocation17] ss:$0 sm:$0xff] }
 0x289   : > { %2965 = vmatpush.bf16.msrb.mxu1 %v4666_v24 }
 0x2a8   : > { %v2647_v50 = vpop.f32.mrf.mxu0 }
 0x2a9   : > { %v2648_v55 = vadd.f32 %v2647_v50, %v2154_v16 }
 0x2ab   : > { %v2661_v22 = vpop.f32.mrf.mxu1 }
 0x2ac   : > { %v2662_v58 = vadd.f32 %v2661_v22, %v2648_v55 }
 0x2b0   : > { %v2649_v57 = vpop.f32.mrf.mxu0 }
 0x2b1   : > { %v2650_v61 = vadd.f32 %v2649_v57, %v2154_v16 }
 0x2b2   : > { %v2675_v2 = vpop.f32.mrf.mxu2 }
 0x2b3   : > { %v2663_v59 = vpop.f32.mrf.mxu1  ;;  %v2676_v62 = vadd.f32 %v2675_v2, %v2662_v58 }
 0x2b4   : > { %v2664_v63 = vadd.f32 %v2663_v59, %v2650_v61 }
 0x2b6   : > { %v2689_v60 = vpop.f32.mrf.mxu3 }
 0x2b7   : > { %v2690_v3 = vadd.f32 %v2689_v60, %v2676_v62 }
 0x2ba   : > { %v2677_v1 = vpop.f32.mrf.mxu2 }
 0x2bb   : > { %v2678_v6 = vadd.f32 %v2677_v1, %v2664_v63 }
 0x2be   : > { %v2691_v9 = vpop.f32.mrf.mxu3 }
 0x2bf   : > { %v2692_v8 = vadd.f32 %v2691_v9, %v2678_v6 }
 0x2c6   : > { %v2703_v4 = vpop.f32.mrf.mxu0 }
 0x2c7   : > { %v2717_v34 = vpop.f32.mrf.mxu1  ;;  %v2704_v7 = vadd.f32 %v2703_v4, %v2690_v3 }
 0x2c9   : > { %v2718_v11 = vadd.f32 %v2717_v34, %v2704_v7 }
 0x2cb   : > { %v2806_v17 = vmax.f32 %v2718_v11, 0.0 }
 0x2ce   : > { %v2705_v12 = vpop.f32.mrf.mxu0  ;;  %v2731_v25 = vpop.f32.mrf.mxu2 }
 0x2cf   : > { %v2706_v13 = vadd.f32 %v2705_v12, %v2692_v8  ;;  %v2719_v14 = vpop.f32.mrf.mxu1  ;;  %v2745_v28 = vpop.f32.mrf.mxu3  ;;  %v2732_v31 = vadd.f32 %v2731_v25, %v2155_v29 }
 0x2d1   : > { %v2720_v18 = vadd.f32 %v2719_v14, %v2706_v13  ;;  %v2746_v36 = vadd.f32 %v2745_v28, %v2732_v31 }
 0x2d3   : > { %v2808_v19 = vmax.f32 %v2720_v18, 0.0 }
 0x2d5   : > { %v2810_v23 = vpack.c.bf16 %v2808_v19, %v2806_v17 }
 0x2d6   : > { %v2733_v30 = vpop.f32.mrf.mxu2 }
 0x2d7   : > { %2952 = vmatmul.bf16.vlgmr.msrb.gmra.mxu0 %v2810_v23  ;;  %v2747_v32 = vpop.f32.mrf.mxu3  ;;  %v2734_v37 = vadd.f32 %v2733_v30, %v2155_v29 }
 0x2d9   : > { %v2748_v40 = vadd.f32 %v2747_v32, %v2734_v37 }
 0x2e6   : > { %v2759_v33 = vpop.f32.mrf.mxu0 }
 0x2e7   : > { %v2773_v35 = vpop.f32.mrf.mxu1  ;;  %v2760_v38 = vadd.f32 %v2759_v33, %v2746_v36 }
 0x2e9   : > { %v2774_v43 = vadd.f32 %v2773_v35, %v2760_v38 }
 0x2ee   : > { %v2787_v39 = vpop.f32.mrf.mxu2  ;;  %v2761_v42 = vpop.f32.mrf.mxu0 }
 0x2ef   : > { %v2801_v41 = vpop.f32.mrf.mxu3  ;;  %v2762_v44 = vadd.f32 %v2761_v42, %v2748_v40  ;;  %v2788_v45 = vadd.f32 %v2787_v39, %v2774_v43  ;;  %v2775_v46 = vpop.f32.mrf.mxu1 }
 0x2f1   : > { %v2776_v47 = vadd.f32 %v2775_v46, %v2762_v44  ;;  %v2802_v49 = vadd.f32 %v2801_v41, %v2788_v45 }
 0x2f3   : > { %v2807_v54 = vmax.f32 %v2802_v49, 0.0 }
 0x2f6   : > { %v2789_v48 = vpop.f32.mrf.mxu2 }
 0x2f7   : > { %v2790_v51 = vadd.f32 %v2789_v48, %v2776_v47  ;;  %v2803_v52 = vpop.f32.mrf.mxu3 }
 0x2f9   : > { %v2804_v53 = vadd.f32 %v2803_v52, %v2790_v51 }
 0x2fb   : > { %v2809_v27 = vmax.f32 %v2804_v53, 0.0 }
 0x2fd   : > { %v2811_v50 = vpack.c.bf16 %v2809_v27, %v2807_v54 }
 0x2ff   : > { %2966 = vmatmul.bf16.vlgmr.msrb.gmra.mxu1 %v2811_v50 }
 0x354   : > { %v2953_v22 = vpop.f32.mrf.mxu0 }
 0x355   : > { %v2954_v16 = vadd.f32 %v4824_v21, %v2953_v22 }
 0x35c   : > { %v2955_v2 = vpop.f32.mrf.mxu0 }
 0x35d   : > { %v2956_v56 = vadd.f32 %v4824_v21, %v2955_v2 }
 0x37c   : > { %v2967_v26 = vpop.f32.mrf.mxu1 }
 0x37d   : > { %v2968_v55 = vadd.f32 %v2967_v26, %v2954_v16 }
 0x37f   : > { %2972 = vst [vmem:[#allocation18] sm:$0xff] %v2968_v55 }
 0x384   : > { %v2969_v57 = vpop.f32.mrf.mxu1 }
 0x385   : > { %v2970_v58 = vadd.f32 %v2969_v57, %v2956_v56 }
 0x387   : > { %2973 = vst [vmem:[#allocation18 + $0x8] sm:$0xff] %v2970_v58 }
 0x388 PF: > { %p4747_p0 = scmp.eq.s32.totalorder %s5271_s23, 3  ;;  %s5173_s22 = smov [#allocation18]  }
 0x389   : > { %s2979_s11 = sshll.u32 %s5173_s22, 4  ;;  %s2981_s2 = sshll.u32 %s5941_s9, 4  ;;  %s2980_s11 = int_to_ptr.vmem [resolvable:$true] %s2979_s11  ;;  %s2982_s2 = int_to_ptr.hbm [resolvable:$true] %s2981_s2 }
 0x38a   : > { %s5174_s7 = smov 128   ;;  %s5175_s8 = smov 8  }
 0x38b   : > { %4706 = dma.vmem_to_hbm [thread:$0]  (%p4747_p0), %s2980_s11, 256, %s2982_s2, [#allocation8], %s5174_s7, %s5174_s7, %s5175_s8  }
 0x38c   : > { %5126 = dma.done.wait (%p4747_p0), [#allocation8], 256  }
 0x38d   : > { %5128 = vsyncadd (%p4747_p0), [#allocation8], 4294967040 }
 0x38e PF: > { %p34_p5 = scmp.ge.s32.totalorder %s5312_s21, 6   ;;  %s5976_s15 = smov %s5135_s0 }
 0x38f   : > { %s5977_s0 = smov %s5139_s16  ;;  %s5978_s16 = smov %s5396_s26 }
 0x390   : > { %s5979_s1 = smov %s5147_s17  ;;  %s5980_s17 = smov %s5151_s18 }
 0x391   : > { %s5981_s18 = smov %s5341_s13  ;;  %s5982_s19 = smov %s5312_s21 }
 0x392   :  { %36 = sbr.rel (!%p34_p5) target bundleno = 22 (0x16), region = 130 }
 0x397   :  { %2998 = vsyncpa [#allocation7], 1 }
 0x398   :  { %3000 = vsyncpa [#allocation7 + $0x1], 1 }
 0x399   :  { %3001 = vsyncpa [#allocation10], 1 }
 0x39a   :  { %3003 = vsyncpa [#allocation10 + $0x1], 1 }
 0x39b   :  { %3004 = vsyncpa [#allocation13], 1 }
 0x39c   :  { %3005 = vsyncpa [#allocation16], 1 }
 0x39d   :  { %3006 = vsyncpa [#allocation8], 1 }
 0x39e   :  { %3008 = vsyncpa [#allocation8 + $0x1], 1 }

</bundles_post_ra>
